<compile_context>
chip_gen: v7x
topology: tpu7x:2x2x1
jax: 0.10.0
libtpu: 0.0.40
codegen_flags: <defaults>
</compile_context>

<pallas_src>
import functools

import jax
import jax.numpy as jnp
from jax import lax
from jax.experimental import pallas as pl
from jax.experimental.pallas import tpu as pltpu

EPS = 1e-5  # nn.GroupNorm default eps


def _group_norm(y, A2, gamma, beta):
    """GroupNorm on a (C, HW) tile (channels on sublanes, pixels on lanes).

    A2 is the (2C, 2C) block-diagonal [A 0; 0 A] matrix with
    A[c, c'] = 1/(cpg*HW) iff c, c' share a group. Stacking [sum ; sum_sq] on
    the sublane axis lets ONE matvec broadcast both group statistics.
    Single-pass E[x^2]-mean^2 variance in f32 (fine at post-conv scales).
    """
    C = y.shape[0]
    s = jnp.sum(y, axis=1, keepdims=True)                      # (C, 1)
    q = jnp.sum(y * y, axis=1, keepdims=True)                  # (C, 1)
    sq = jnp.concatenate([s, q], axis=0)                       # (2C, 1), f32, 8-aligned
    me = jnp.dot(A2, sq, preferred_element_type=jnp.float32)   # (2C, 1)
    m, e2 = me[:C], me[C:]
    var = e2 - m * m                                           # biased (PyTorch GN)
    inv = lax.rsqrt(var + EPS)
    return (y - m) * inv * gamma + beta


def bottleneck_kernel(x_ref,
                      w1_ref, b1_ref, g1_ref, be1_ref, A1_ref,
                      w2_ref, b2_ref, g2_ref, be2_ref,
                      w3_ref, b3_ref, g3_ref, be3_ref, A3_ref,
                      mask_ref,
                      out_ref, *, W, compute_dtype, unroll):
    bb, _, HW = x_ref.shape
    cdt = compute_dtype

    # Hoist all parameter / mask loads out of the batch & tap loops (JAX does
    # not CSE broadcast_in_dim / loads re-emitted inside unrolled loops).
    w1 = w1_ref[...]
    w2f = w2_ref[...]          # (C1, 9*C1) im2col-flattened 3x3 weights
    w3 = w3_ref[...]
    b1, g1, be1 = b1_ref[...], g1_ref[...], be1_ref[...]
    b2, g2, be2 = b2_ref[...], g2_ref[...], be2_ref[...]
    b3, g3, be3 = b3_ref[...], g3_ref[...], be3_ref[...]
    A1 = A1_ref[...]
    A3 = A3_ref[...]
    maskb = mask_ref[...]      # (9*C1, HW) border masks, channel-broadcast

    # Static lane shifts of the 9 taps of a 3x3 / pad=1 / stride=1 conv.
    shifts = [(-((k // 3 - 1) * W + (k % 3 - 1))) % HW for k in range(9)]

    def body(b, carry):
        x = x_ref[b]                                           # (Cin, HW) f32

        # ---- conv1 (1x1) + GroupNorm + relu --------------------------------
        y = jnp.dot(w1, x.astype(cdt), preferred_element_type=jnp.float32) + b1
        y = jnp.maximum(_group_norm(y, A1, g1, be1), 0.0)

        # ---- conv2 (3x3, pad=1) as ONE im2col matmul -----------------------
        # 9 taps = cyclic lane shifts (XLU slot), concatenated on sublanes
        # (layout-free: C1 rows are 8-aligned in f32), masked once, cast once,
        # then a single K=9*C1 MXU dot with hardware f32 accumulation.
        taps = [y if shifts[k] == 0 else pltpu.roll(y, shifts[k], 1)
                for k in range(9)]
        T = (jnp.concatenate(taps, axis=0) * maskb).astype(cdt)  # (9*C1, HW)
        y = jnp.dot(w2f, T, preferred_element_type=jnp.float32) + b2
        y = jnp.maximum(_group_norm(y, A1, g2, be2), 0.0)

        # ---- conv3 (1x1) + GroupNorm + relu --------------------------------
        y = jnp.dot(w3, y.astype(cdt), preferred_element_type=jnp.float32) + b3
        y = jnp.maximum(_group_norm(y, A3, g3, be3), 0.0)

        # ---- residual add + relu (stride=1 -> identity shortcut) -----------
        out_ref[b] = jnp.maximum(x + y, 0.0).astype(out_ref.dtype)
        return carry

    # Bounded loop (small unroll) instead of a full static unroll: keeps 1-2
    # images in flight for latency hiding without blowing the 64-vreg file.
    lax.fori_loop(0, bb, body, 0, unroll=unroll)


# --------------------------- wrapper-side helpers ---------------------------
def _gn_matrix(C, groups, hw):
    cpg = C // groups
    idx = jnp.arange(C)
    same = (idx[:, None] // cpg) == (idx[None, :] // cpg)
    return same.astype(jnp.float32) / float(cpg * hw)


def _gn_matrix2(C, groups, hw):
    """Block-diagonal [A 0; 0 A] so one matvec broadcasts mean and E[x^2]."""
    A = _gn_matrix(C, groups, hw)
    Z = jnp.zeros_like(A)
    return jnp.block([[A, Z], [Z, A]])


def _tap_masks(H, W):
    """(9, 1, H*W) f32 validity masks for the 9 taps of a 3x3 / pad=1 conv."""
    hw = jnp.arange(H * W)
    h, w = hw // W, hw % W
    rows = []
    for ky in range(3):
        for kx in range(3):
            valid = ((h + ky - 1 >= 0) & (h + ky - 1 < H) &
                     (w + kx - 1 >= 0) & (w + kx - 1 < W))
            rows.append(valid.astype(jnp.float32))
    return jnp.stack(rows, axis=0)[:, None, :]


def _num_parallel_tensorcores():
    """Best-effort: TensorCores sharing the grid on one chip (megacore/v7x)."""
    try:
        kind = jax.devices()[0].device_kind.lower()
    except Exception:
        return 1
    if ("v4" in kind) or ("v5p" in kind) or ("v7" in kind):
        return 2
    return 1  # v5e / v6e: single TensorCore, grid is a sequential loop


def _default_compute_dtype():
    """bf16 MXU operands pay off on v6e/v7x; keep f32 on v5e (no bf16 VPU)."""
    try:
        kind = jax.devices()[0].device_kind.lower()
    except Exception:
        return jnp.float32
    if ("v6" in kind) or ("v7" in kind):
        return jnp.bfloat16
    return jnp.float32


def _pick_batch_block(N, n_cores, cap=32):
    """Fattest batch block (amortize ~0.35us/step); even grid on multi-TC."""
    cap = min(cap, N)
    if n_cores > 1:
        for bb in range(cap, 0, -1):
            if N % bb == 0 and (N // bb) % n_cores == 0:
                return bb
    for bb in range(cap, 0, -1):
        if N % bb == 0:
            return bb
    return 1


def bottleneck_block(x_nchw, params, *, planes, num_groups,
                     compute_dtype=None, out_dtype=jnp.float32):
    """Fused BottleneckBlock forward (norm_fn='group', stride=1). x is NCHW."""
    N, Cin, H, W = x_nchw.shape
    assert Cin == planes, "stride=1 identity shortcut requires in_planes == planes"
    C1 = planes // 4
    HW = H * W
    # Lane-dense stores are the biggest layout lever: keep the lane axis >=128.
    assert HW % 128 == 0, "H*W must be a multiple of 128"
    # TODO(synk): for H*W < 128, fold several images onto the lane axis.

    if compute_dtype is None:
        compute_dtype = _default_compute_dtype()
    cdt = compute_dtype

    n_cores = _num_parallel_tensorcores()
    bb = _pick_batch_block(N, n_cores)
    unroll = 2 if bb >= 2 else 1

    x = x_nchw.reshape(N, Cin, HW)      # free: NCHW memory already is (N, C, HW)
    A1 = _gn_matrix2(C1, num_groups, HW)
    A3 = _gn_matrix2(planes, num_groups, HW)
    masks = _tap_masks(H, W)                                            # (9,1,HW)
    mask_block = jnp.broadcast_to(masks, (9, C1, HW)).reshape(9 * C1, HW)

    w1 = params["w1"].astype(cdt)
    # im2col-flatten the 3x3 weights: (9, Cout, Cin) -> (Cout, 9*Cin)
    w2f = jnp.transpose(params["w2"], (1, 0, 2)).reshape(C1, 9 * C1).astype(cdt)
    w3 = params["w3"].astype(cdt)

    full = lambda shape: pl.BlockSpec(shape, lambda n: (0,) * len(shape))

    grid_spec = pltpu.PrefetchScalarGridSpec(
        num_scalar_prefetch=0,
        grid=(N // bb,),
        in_specs=[
            pl.BlockSpec((bb, Cin, HW), lambda n: (n, 0, 0)),                 # x
            full((C1, Cin)), full((C1, 1)), full((C1, 1)), full((C1, 1)),     # conv1/gn1
            full((2 * C1, 2 * C1)),                                           # A1 block-diag
            full((C1, 9 * C1)), full((C1, 1)), full((C1, 1)), full((C1, 1)),  # conv2/gn2
            full((planes, C1)), full((planes, 1)), full((planes, 1)), full((planes, 1)),
            full((2 * planes, 2 * planes)),                                   # A3 block-diag
            full((9 * C1, HW)),                                               # tap masks
        ],
        out_specs=pl.BlockSpec((bb, planes, HW), lambda n: (n, 0, 0)),
    )

    # Explicit VMEM budget: double-buffered x/out blocks + params + margin.
    block_bytes = bb * (Cin + planes) * HW * 4
    vmem_limit = int(min(max(4 * block_bytes + (8 << 20), 32 << 20), 48 << 20))

    itemsize = jnp.dtype(cdt).itemsize
    cost = pl.CostEstimate(
        flops=2 * N * HW * (C1 * Cin + C1 * 9 * C1 + planes * C1),
        transcendentals=N * (2 * C1 + planes),
        bytes_accessed=4 * N * (Cin + planes) * HW
        + itemsize * (w1.size + w2f.size + w3.size),
    )

    kernel = functools.partial(bottleneck_kernel, W=W, compute_dtype=cdt,
                               unroll=unroll)
    out = pl.pallas_call(
        kernel,
        out_shape=jax.ShapeDtypeStruct((N, planes, HW), out_dtype),
        grid_spec=grid_spec,
        compiler_params=pltpu.CompilerParams(
            dimension_semantics=("parallel",),
            vmem_limit_bytes=vmem_limit),
        cost_estimate=cost,
    )(x,
      w1, params["b1"], params["g1"], params["be1"], A1,
      w2f, params["b2"], params["g2"], params["be2"],
      w3, params["b3"], params["g3"], params["be3"], A3,
      mask_block)
    return out.reshape(N, planes, H, W)


# ------------------------- pure-JAX reference (NCHW) ------------------------
def _ref_gn(y, gamma, beta, groups):
    N, C, H, W = y.shape
    cpg = C // groups
    yr = y.reshape(N, groups, cpg, H, W)
    m = yr.mean(axis=(2, 3, 4), keepdims=True)
    v = ((yr - m) ** 2).mean(axis=(2, 3, 4), keepdims=True)
    yn = ((yr - m) / jnp.sqrt(v + EPS)).reshape(N, C, H, W)
    return yn * gamma.reshape(1, C, 1, 1) + beta.reshape(1, C, 1, 1)


def ref_forward(x, p, num_groups):
    relu = lambda t: jnp.maximum(t, 0.0)
    y = jnp.einsum('oc,nchw->nohw', p["w1"], x) + p["b1"].reshape(1, -1, 1, 1)
    y = relu(_ref_gn(y, p["g1"], p["be1"], num_groups))
    C1 = p["w2"].shape[1]
    w2 = jnp.transpose(p["w2"].reshape(3, 3, C1, C1), (2, 3, 0, 1))  # -> OIHW
    y = jax.lax.conv_general_dilated(
        y, w2, window_strides=(1, 1), padding=((1, 1), (1, 1)),
        dimension_numbers=('NCHW', 'OIHW', 'NCHW')) + p["b2"].reshape(1, -1, 1, 1)
    y = relu(_ref_gn(y, p["g2"], p["be2"], num_groups))
    y = jnp.einsum('oc,nchw->nohw', p["w3"], y) + p["b3"].reshape(1, -1, 1, 1)
    y = relu(_ref_gn(y, p["g3"], p["be3"], num_groups))
    return relu(x + y)


if __name__ == "__main__":
    # Small shapes consistent with the module: in_planes == planes (stride=1).
    N, H, W = 2, 16, 16
    in_planes = planes = 32
    C1 = planes // 4          # 8
    num_groups = planes // 8  # 4

    key = jax.random.PRNGKey(0)
    ks = jax.random.split(key, 13)
    params = {
        "w1": 0.1 * jax.random.normal(ks[0], (C1, in_planes), jnp.float32),
        "b1": 0.1 * jax.random.normal(ks[1], (C1, 1), jnp.float32),
        "g1": 1.0 + 0.1 * jax.random.normal(ks[2], (C1, 1), jnp.float32),
        "be1": 0.1 * jax.random.normal(ks[3], (C1, 1), jnp.float32),
        "w2": 0.1 * jax.random.normal(ks[4], (9, C1, C1), jnp.float32),  # (k, Cout, Cin)
        "b2": 0.1 * jax.random.normal(ks[5], (C1, 1), jnp.float32),
        "g2": 1.0 + 0.1 * jax.random.normal(ks[6], (C1, 1), jnp.float32),
        "be2": 0.1 * jax.random.normal(ks[7], (C1, 1), jnp.float32),
        "w3": 0.1 * jax.random.normal(ks[8], (planes, C1), jnp.float32),
        "b3": 0.1 * jax.random.normal(ks[9], (planes, 1), jnp.float32),
        "g3": 1.0 + 0.1 * jax.random.normal(ks[10], (planes, 1), jnp.float32),
        "be3": 0.1 * jax.random.normal(ks[11], (planes, 1), jnp.float32),
    }

    # Input stays in PyTorch's NCHW layout end-to-end (no transposes needed).
    x = jax.random.normal(ks[12], (N, in_planes, H, W), jnp.float32)

    ref = jax.block_until_ready(ref_forward(x, params, num_groups))

    # f32 matmul path (tight check).
    out_f32 = jax.block_until_ready(
        bottleneck_block(x, params, planes=planes, num_groups=num_groups,
                         compute_dtype=jnp.float32))
    assert out_f32.shape == (N, planes, H, W)
    err = float(jnp.max(jnp.abs(out_f32 - ref)))
    assert jnp.allclose(out_f32, ref, atol=2e-3, rtol=2e-3), f"f32 max err {err}"

    # bf16 matmul operands (v6e/v7x fast path); tolerance tightened from 1e-1.
    out_bf16 = jax.block_until_ready(
        bottleneck_block(x, params, planes=planes, num_groups=num_groups,
                         compute_dtype=jnp.bfloat16))
    err_bf = float(jnp.max(jnp.abs(out_bf16 - ref)))
    assert jnp.allclose(out_bf16, ref, atol=7e-2, rtol=7e-2), f"bf16 max err {err_bf}"

    print("KERNEL_OK")
</pallas_src>

<mosaic_0001>
module attributes {stable_mosaic.version = 11 : i64} {
  func.func @bottleneck_kernel(%arg0: i32, %arg1: memref<2x32x256xf32, #tpu.memory_space<vmem>>, %arg2: memref<8x32xf32, #tpu.memory_space<vmem>>, %arg3: memref<8x1xf32, #tpu.memory_space<vmem>>, %arg4: memref<8x1xf32, #tpu.memory_space<vmem>>, %arg5: memref<8x1xf32, #tpu.memory_space<vmem>>, %arg6: memref<16x16xf32, #tpu.memory_space<vmem>>, %arg7: memref<8x72xf32, #tpu.memory_space<vmem>>, %arg8: memref<8x1xf32, #tpu.memory_space<vmem>>, %arg9: memref<8x1xf32, #tpu.memory_space<vmem>>, %arg10: memref<8x1xf32, #tpu.memory_space<vmem>>, %arg11: memref<32x8xf32, #tpu.memory_space<vmem>>, %arg12: memref<32x1xf32, #tpu.memory_space<vmem>>, %arg13: memref<32x1xf32, #tpu.memory_space<vmem>>, %arg14: memref<32x1xf32, #tpu.memory_space<vmem>>, %arg15: memref<64x64xf32, #tpu.memory_space<vmem>>, %arg16: memref<72x256xf32, #tpu.memory_space<vmem>>, %arg17: memref<2x32x256xf32, #tpu.memory_space<vmem>>) attributes {dimension_semantics = [#tpu.dimension_semantics<parallel>], iteration_bounds = array<i64: 1>, scalar_prefetch = 0 : i64, scratch_operands = 0 : i64, tpu.core_type = #tpu.core_type<tc>, window_params = [{transform_indices = @transform_0, window_bounds = array<i64: 2, 32, 256>}, {pipeline_mode = #tpu.pipeline_mode<synchronous>, transform_indices = @transform_1, window_bounds = array<i64: 8, 32>}, {pipeline_mode = #tpu.pipeline_mode<synchronous>, transform_indices = @transform_2, window_bounds = array<i64: 8, 1>}, {pipeline_mode = #tpu.pipeline_mode<synchronous>, transform_indices = @transform_3, window_bounds = array<i64: 8, 1>}, {pipeline_mode = #tpu.pipeline_mode<synchronous>, transform_indices = @transform_4, window_bounds = array<i64: 8, 1>}, {pipeline_mode = #tpu.pipeline_mode<synchronous>, transform_indices = @transform_5, window_bounds = array<i64: 16, 16>}, {pipeline_mode = #tpu.pipeline_mode<synchronous>, transform_indices = @transform_6, window_bounds = array<i64: 8, 72>}, {pipeline_mode = #tpu.pipeline_mode<synchronous>, transform_indices = @transform_7, window_bounds = array<i64: 8, 1>}, {pipeline_mode = #tpu.pipeline_mode<synchronous>, transform_indices = @transform_8, window_bounds = array<i64: 8, 1>}, {pipeline_mode = #tpu.pipeline_mode<synchronous>, transform_indices = @transform_9, window_bounds = array<i64: 8, 1>}, {pipeline_mode = #tpu.pipeline_mode<synchronous>, transform_indices = @transform_10, window_bounds = array<i64: 32, 8>}, {pipeline_mode = #tpu.pipeline_mode<synchronous>, transform_indices = @transform_11, window_bounds = array<i64: 32, 1>}, {pipeline_mode = #tpu.pipeline_mode<synchronous>, transform_indices = @transform_12, window_bounds = array<i64: 32, 1>}, {pipeline_mode = #tpu.pipeline_mode<synchronous>, transform_indices = @transform_13, window_bounds = array<i64: 32, 1>}, {pipeline_mode = #tpu.pipeline_mode<synchronous>, transform_indices = @transform_14, window_bounds = array<i64: 64, 64>}, {pipeline_mode = #tpu.pipeline_mode<synchronous>, transform_indices = @transform_15, window_bounds = array<i64: 72, 256>}, {transform_indices = @transform_16, window_bounds = array<i64: 2, 32, 256>}]} {
    %c0 = arith.constant 0 : index
    %c0_0 = arith.constant 0 : index
    %0 = vector.load %arg2[%c0, %c0_0] : memref<8x32xf32, #tpu.memory_space<vmem>>, vector<8x32xf32>
    %c0_1 = arith.constant 0 : index
    %c0_2 = arith.constant 0 : index
    %1 = vector.load %arg7[%c0_1, %c0_2] : memref<8x72xf32, #tpu.memory_space<vmem>>, vector<8x72xf32>
    %c0_3 = arith.constant 0 : index
    %c0_4 = arith.constant 0 : index
    %2 = vector.load %arg11[%c0_3, %c0_4] : memref<32x8xf32, #tpu.memory_space<vmem>>, vector<32x8xf32>
    %c0_5 = arith.constant 0 : index
    %c0_6 = arith.constant 0 : index
    %3 = vector.load %arg3[%c0_5, %c0_6] : memref<8x1xf32, #tpu.memory_space<vmem>>, vector<8x1xf32>
    %c0_7 = arith.constant 0 : index
    %c0_8 = arith.constant 0 : index
    %4 = vector.load %arg4[%c0_7, %c0_8] : memref<8x1xf32, #tpu.memory_space<vmem>>, vector<8x1xf32>
    %c0_9 = arith.constant 0 : index
    %c0_10 = arith.constant 0 : index
    %5 = vector.load %arg5[%c0_9, %c0_10] : memref<8x1xf32, #tpu.memory_space<vmem>>, vector<8x1xf32>
    %c0_11 = arith.constant 0 : index
    %c0_12 = arith.constant 0 : index
    %6 = vector.load %arg8[%c0_11, %c0_12] : memref<8x1xf32, #tpu.memory_space<vmem>>, vector<8x1xf32>
    %c0_13 = arith.constant 0 : index
    %c0_14 = arith.constant 0 : index
    %7 = vector.load %arg9[%c0_13, %c0_14] : memref<8x1xf32, #tpu.memory_space<vmem>>, vector<8x1xf32>
    %c0_15 = arith.constant 0 : index
    %c0_16 = arith.constant 0 : index
    %8 = vector.load %arg10[%c0_15, %c0_16] : memref<8x1xf32, #tpu.memory_space<vmem>>, vector<8x1xf32>
    %c0_17 = arith.constant 0 : index
    %c0_18 = arith.constant 0 : index
    %9 = vector.load %arg12[%c0_17, %c0_18] : memref<32x1xf32, #tpu.memory_space<vmem>>, vector<32x1xf32>
    %c0_19 = arith.constant 0 : index
    %c0_20 = arith.constant 0 : index
    %10 = vector.load %arg13[%c0_19, %c0_20] : memref<32x1xf32, #tpu.memory_space<vmem>>, vector<32x1xf32>
    %c0_21 = arith.constant 0 : index
    %c0_22 = arith.constant 0 : index
    %11 = vector.load %arg14[%c0_21, %c0_22] : memref<32x1xf32, #tpu.memory_space<vmem>>, vector<32x1xf32>
    %c0_23 = arith.constant 0 : index
    %c0_24 = arith.constant 0 : index
    %12 = vector.load %arg6[%c0_23, %c0_24] : memref<16x16xf32, #tpu.memory_space<vmem>>, vector<16x16xf32>
    %c0_25 = arith.constant 0 : index
    %c0_26 = arith.constant 0 : index
    %13 = vector.load %arg15[%c0_25, %c0_26] : memref<64x64xf32, #tpu.memory_space<vmem>>, vector<64x64xf32>
    %c0_27 = arith.constant 0 : index
    %c0_28 = arith.constant 0 : index
    %14 = vector.load %arg16[%c0_27, %c0_28] : memref<72x256xf32, #tpu.memory_space<vmem>>, vector<72x256xf32>
    %c0_i32 = arith.constant 0 : i32
    %15 = arith.index_cast %c0_i32 : i32 to index
    %c0_29 = arith.constant 0 : index
    %c0_30 = arith.constant 0 : index
    %16 = vector.load %arg1[%15, %c0_29, %c0_30] : memref<2x32x256xf32, #tpu.memory_space<vmem>>, vector<1x32x256xf32>
    %17 = vector.shape_cast %16 : vector<1x32x256xf32> to vector<32x256xf32>
    %cst = arith.constant dense<0.000000e+00> : vector<8x256xf32>
    %18 = tpu.matmul %0, %17, %cst {dimension_numbers = #tpu.dot_dimension_numbers<[1], [0], [0], [1], [0, 0, 1, 1], [], []>} : vector<8x32xf32>, vector<32x256xf32>, vector<8x256xf32> -> vector<8x256xf32>
    %19 = vector.broadcast %3 : vector<8x1xf32> to vector<8x256xf32>
    %20 = arith.addf %18, %19 : vector<8x256xf32>
    %cst_31 = arith.constant dense<0.000000e+00> : vector<8xf32>
    %21 = vector.multi_reduction <add>, %20, %cst_31 [1] : vector<8x256xf32> to vector<8xf32>
    %22 = vector.shape_cast %21 : vector<8xf32> to vector<8x1xf32>
    %23 = arith.mulf %20, %20 : vector<8x256xf32>
    %cst_32 = arith.constant dense<0.000000e+00> : vector<8xf32>
    %24 = vector.multi_reduction <add>, %23, %cst_32 [1] : vector<8x256xf32> to vector<8xf32>
    %25 = vector.shape_cast %24 : vector<8xf32> to vector<8x1xf32>
    %26 = tpu.concatenate %22, %25 in 0 : vector<8x1xf32>, vector<8x1xf32> -> vector<16x1xf32>
    %cst_33 = arith.constant dense<0.000000e+00> : vector<16x1xf32>
    %27 = tpu.matmul %12, %26, %cst_33 {dimension_numbers = #tpu.dot_dimension_numbers<[1], [0], [0], [1], [0, 0, 1, 1], [], []>} : vector<16x16xf32>, vector<16x1xf32>, vector<16x1xf32> -> vector<16x1xf32>
    %28 = vector.extract_strided_slice %27 {offsets = [0, 0], sizes = [8, 1], strides = [1, 1]} : vector<16x1xf32> to vector<8x1xf32>
    %29 = vector.extract_strided_slice %27 {offsets = [8, 0], sizes = [8, 1], strides = [1, 1]} : vector<16x1xf32> to vector<8x1xf32>
    %30 = arith.mulf %28, %28 : vector<8x1xf32>
    %31 = arith.subf %29, %30 : vector<8x1xf32>
    %cst_34 = arith.constant 9.99999974E-6 : f32
    %32 = vector.broadcast %cst_34 : f32 to vector<8x1xf32>
    %33 = arith.addf %31, %32 : vector<8x1xf32>
    %34 = math.rsqrt %33 : vector<8x1xf32>
    %35 = vector.broadcast %28 : vector<8x1xf32> to vector<8x256xf32>
    %36 = arith.subf %20, %35 : vector<8x256xf32>
    %37 = vector.broadcast %34 : vector<8x1xf32> to vector<8x256xf32>
    %38 = arith.mulf %36, %37 : vector<8x256xf32>
    %39 = vector.broadcast %4 : vector<8x1xf32> to vector<8x256xf32>
    %40 = arith.mulf %38, %39 : vector<8x256xf32>
    %41 = vector.broadcast %5 : vector<8x1xf32> to vector<8x256xf32>
    %42 = arith.addf %40, %41 : vector<8x256xf32>
    %cst_35 = arith.constant 0.000000e+00 : f32
    %43 = vector.broadcast %cst_35 : f32 to vector<8x256xf32>
    %44 = arith.maximumf %42, %43 : vector<8x256xf32>
    %c17_i32 = arith.constant 17 : i32
    %45 = tpu.dynamic_rotate %44 by %c17_i32 dim 1 : vector<8x256xf32>, i32 -> vector<8x256xf32>
    %c16_i32 = arith.constant 16 : i32
    %46 = tpu.dynamic_rotate %44 by %c16_i32 dim 1 : vector<8x256xf32>, i32 -> vector<8x256xf32>
    %c15_i32 = arith.constant 15 : i32
    %47 = tpu.dynamic_rotate %44 by %c15_i32 dim 1 : vector<8x256xf32>, i32 -> vector<8x256xf32>
    %c1_i32 = arith.constant 1 : i32
    %48 = tpu.dynamic_rotate %44 by %c1_i32 dim 1 : vector<8x256xf32>, i32 -> vector<8x256xf32>
    %c255_i32 = arith.constant 255 : i32
    %49 = tpu.dynamic_rotate %44 by %c255_i32 dim 1 : vector<8x256xf32>, i32 -> vector<8x256xf32>
    %c241_i32 = arith.constant 241 : i32
    %50 = tpu.dynamic_rotate %44 by %c241_i32 dim 1 : vector<8x256xf32>, i32 -> vector<8x256xf32>
    %c240_i32 = arith.constant 240 : i32
    %51 = tpu.dynamic_rotate %44 by %c240_i32 dim 1 : vector<8x256xf32>, i32 -> vector<8x256xf32>
    %c239_i32 = arith.constant 239 : i32
    %52 = tpu.dynamic_rotate %44 by %c239_i32 dim 1 : vector<8x256xf32>, i32 -> vector<8x256xf32>
    %53 = tpu.concatenate %45, %46, %47, %48, %44, %49, %50, %51, %52 in 0 : vector<8x256xf32>, vector<8x256xf32>, vector<8x256xf32>, vector<8x256xf32>, vector<8x256xf32>, vector<8x256xf32>, vector<8x256xf32>, vector<8x256xf32>, vector<8x256xf32> -> vector<72x256xf32>
    %54 = arith.mulf %53, %14 : vector<72x256xf32>
    %cst_36 = arith.constant dense<0.000000e+00> : vector<8x256xf32>
    %55 = tpu.matmul %1, %54, %cst_36 {dimension_numbers = #tpu.dot_dimension_numbers<[1], [0], [0], [1], [0, 0, 1, 1], [], []>} : vector<8x72xf32>, vector<72x256xf32>, vector<8x256xf32> -> vector<8x256xf32>
    %56 = vector.broadcast %6 : vector<8x1xf32> to vector<8x256xf32>
    %57 = arith.addf %55, %56 : vector<8x256xf32>
    %cst_37 = arith.constant dense<0.000000e+00> : vector<8xf32>
    %58 = vector.multi_reduction <add>, %57, %cst_37 [1] : vector<8x256xf32> to vector<8xf32>
    %59 = vector.shape_cast %58 : vector<8xf32> to vector<8x1xf32>
    %60 = arith.mulf %57, %57 : vector<8x256xf32>
    %cst_38 = arith.constant dense<0.000000e+00> : vector<8xf32>
    %61 = vector.multi_reduction <add>, %60, %cst_38 [1] : vector<8x256xf32> to vector<8xf32>
    %62 = vector.shape_cast %61 : vector<8xf32> to vector<8x1xf32>
    %63 = tpu.concatenate %59, %62 in 0 : vector<8x1xf32>, vector<8x1xf32> -> vector<16x1xf32>
    %cst_39 = arith.constant dense<0.000000e+00> : vector<16x1xf32>
    %64 = tpu.matmul %12, %63, %cst_39 {dimension_numbers = #tpu.dot_dimension_numbers<[1], [0], [0], [1], [0, 0, 1, 1], [], []>} : vector<16x16xf32>, vector<16x1xf32>, vector<16x1xf32> -> vector<16x1xf32>
    %65 = vector.extract_strided_slice %64 {offsets = [0, 0], sizes = [8, 1], strides = [1, 1]} : vector<16x1xf32> to vector<8x1xf32>
    %66 = vector.extract_strided_slice %64 {offsets = [8, 0], sizes = [8, 1], strides = [1, 1]} : vector<16x1xf32> to vector<8x1xf32>
    %67 = arith.mulf %65, %65 : vector<8x1xf32>
    %68 = arith.subf %66, %67 : vector<8x1xf32>
    %cst_40 = arith.constant 9.99999974E-6 : f32
    %69 = vector.broadcast %cst_40 : f32 to vector<8x1xf32>
    %70 = arith.addf %68, %69 : vector<8x1xf32>
    %71 = math.rsqrt %70 : vector<8x1xf32>
    %72 = vector.broadcast %65 : vector<8x1xf32> to vector<8x256xf32>
    %73 = arith.subf %57, %72 : vector<8x256xf32>
    %74 = vector.broadcast %71 : vector<8x1xf32> to vector<8x256xf32>
    %75 = arith.mulf %73, %74 : vector<8x256xf32>
    %76 = vector.broadcast %7 : vector<8x1xf32> to vector<8x256xf32>
    %77 = arith.mulf %75, %76 : vector<8x256xf32>
    %78 = vector.broadcast %8 : vector<8x1xf32> to vector<8x256xf32>
    %79 = arith.addf %77, %78 : vector<8x256xf32>
    %cst_41 = arith.constant 0.000000e+00 : f32
    %80 = vector.broadcast %cst_41 : f32 to vector<8x256xf32>
    %81 = arith.maximumf %79, %80 : vector<8x256xf32>
    %cst_42 = arith.constant dense<0.000000e+00> : vector<32x256xf32>
    %82 = tpu.matmul %2, %81, %cst_42 {dimension_numbers = #tpu.dot_dimension_numbers<[1], [0], [0], [1], [0, 0, 1, 1], [], []>} : vector<32x8xf32>, vector<8x256xf32>, vector<32x256xf32> -> vector<32x256xf32>
    %83 = vector.broadcast %9 : vector<32x1xf32> to vector<32x256xf32>
    %84 = arith.addf %82, %83 : vector<32x256xf32>
    %cst_43 = arith.constant dense<0.000000e+00> : vector<32xf32>
    %85 = vector.multi_reduction <add>, %84, %cst_43 [1] : vector<32x256xf32> to vector<32xf32>
    %86 = vector.shape_cast %85 : vector<32xf32> to vector<32x1xf32>
    %87 = arith.mulf %84, %84 : vector<32x256xf32>
    %cst_44 = arith.constant dense<0.000000e+00> : vector<32xf32>
    %88 = vector.multi_reduction <add>, %87, %cst_44 [1] : vector<32x256xf32> to vector<32xf32>
    %89 = vector.shape_cast %88 : vector<32xf32> to vector<32x1xf32>
    %90 = tpu.concatenate %86, %89 in 0 : vector<32x1xf32>, vector<32x1xf32> -> vector<64x1xf32>
    %cst_45 = arith.constant dense<0.000000e+00> : vector<64x1xf32>
    %91 = tpu.matmul %13, %90, %cst_45 {dimension_numbers = #tpu.dot_dimension_numbers<[1], [0], [0], [1], [0, 0, 1, 1], [], []>} : vector<64x64xf32>, vector<64x1xf32>, vector<64x1xf32> -> vector<64x1xf32>
    %92 = vector.extract_strided_slice %91 {offsets = [0, 0], sizes = [32, 1], strides = [1, 1]} : vector<64x1xf32> to vector<32x1xf32>
    %93 = vector.extract_strided_slice %91 {offsets = [32, 0], sizes = [32, 1], strides = [1, 1]} : vector<64x1xf32> to vector<32x1xf32>
    %94 = arith.mulf %92, %92 : vector<32x1xf32>
    %95 = arith.subf %93, %94 : vector<32x1xf32>
    %cst_46 = arith.constant 9.99999974E-6 : f32
    %96 = vector.broadcast %cst_46 : f32 to vector<32x1xf32>
    %97 = arith.addf %95, %96 : vector<32x1xf32>
    %98 = math.rsqrt %97 : vector<32x1xf32>
    %99 = vector.broadcast %92 : vector<32x1xf32> to vector<32x256xf32>
    %100 = arith.subf %84, %99 : vector<32x256xf32>
    %101 = vector.broadcast %98 : vector<32x1xf32> to vector<32x256xf32>
    %102 = arith.mulf %100, %101 : vector<32x256xf32>
    %103 = vector.broadcast %10 : vector<32x1xf32> to vector<32x256xf32>
    %104 = arith.mulf %102, %103 : vector<32x256xf32>
    %105 = vector.broadcast %11 : vector<32x1xf32> to vector<32x256xf32>
    %106 = arith.addf %104, %105 : vector<32x256xf32>
    %cst_47 = arith.constant 0.000000e+00 : f32
    %107 = vector.broadcast %cst_47 : f32 to vector<32x256xf32>
    %108 = arith.maximumf %106, %107 : vector<32x256xf32>
    %109 = arith.addf %17, %108 : vector<32x256xf32>
    %cst_48 = arith.constant 0.000000e+00 : f32
    %110 = vector.broadcast %cst_48 : f32 to vector<32x256xf32>
    %111 = arith.maximumf %109, %110 : vector<32x256xf32>
    %112 = arith.index_cast %c0_i32 : i32 to index
    %c0_49 = arith.constant 0 : index
    %c0_50 = arith.constant 0 : index
    %113 = vector.load %arg17[%112, %c0_49, %c0_50] : memref<2x32x256xf32, #tpu.memory_space<vmem>>, vector<1x32x256xf32>
    %114 = vector.shape_cast %113 : vector<1x32x256xf32> to vector<32x256xf32>
    %115 = vector.shape_cast %111 : vector<32x256xf32> to vector<1x32x256xf32>
    tpu.vector_store %arg17[%112, %c0_49, %c0_50], %115 {strides = array<i32>} : memref<2x32x256xf32, #tpu.memory_space<vmem>>, vector<1x32x256xf32>,
    %c1_i32_51 = arith.constant 1 : i32
    %116 = arith.index_cast %c1_i32_51 : i32 to index
    %c0_52 = arith.constant 0 : index
    %c0_53 = arith.constant 0 : index
    %117 = vector.load %arg1[%116, %c0_52, %c0_53] : memref<2x32x256xf32, #tpu.memory_space<vmem>>, vector<1x32x256xf32>
    %118 = vector.shape_cast %117 : vector<1x32x256xf32> to vector<32x256xf32>
    %cst_54 = arith.constant dense<0.000000e+00> : vector<8x256xf32>
    %119 = tpu.matmul %0, %118, %cst_54 {dimension_numbers = #tpu.dot_dimension_numbers<[1], [0], [0], [1], [0, 0, 1, 1], [], []>} : vector<8x32xf32>, vector<32x256xf32>, vector<8x256xf32> -> vector<8x256xf32>
    %120 = vector.broadcast %3 : vector<8x1xf32> to vector<8x256xf32>
    %121 = arith.addf %119, %120 : vector<8x256xf32>
    %cst_55 = arith.constant dense<0.000000e+00> : vector<8xf32>
    %122 = vector.multi_reduction <add>, %121, %cst_55 [1] : vector<8x256xf32> to vector<8xf32>
    %123 = vector.shape_cast %122 : vector<8xf32> to vector<8x1xf32>
    %124 = arith.mulf %121, %121 : vector<8x256xf32>
    %cst_56 = arith.constant dense<0.000000e+00> : vector<8xf32>
    %125 = vector.multi_reduction <add>, %124, %cst_56 [1] : vector<8x256xf32> to vector<8xf32>
    %126 = vector.shape_cast %125 : vector<8xf32> to vector<8x1xf32>
    %127 = tpu.concatenate %123, %126 in 0 : vector<8x1xf32>, vector<8x1xf32> -> vector<16x1xf32>
    %cst_57 = arith.constant dense<0.000000e+00> : vector<16x1xf32>
    %128 = tpu.matmul %12, %127, %cst_57 {dimension_numbers = #tpu.dot_dimension_numbers<[1], [0], [0], [1], [0, 0, 1, 1], [], []>} : vector<16x16xf32>, vector<16x1xf32>, vector<16x1xf32> -> vector<16x1xf32>
    %129 = vector.extract_strided_slice %128 {offsets = [0, 0], sizes = [8, 1], strides = [1, 1]} : vector<16x1xf32> to vector<8x1xf32>
    %130 = vector.extract_strided_slice %128 {offsets = [8, 0], sizes = [8, 1], strides = [1, 1]} : vector<16x1xf32> to vector<8x1xf32>
    %131 = arith.mulf %129, %129 : vector<8x1xf32>
    %132 = arith.subf %130, %131 : vector<8x1xf32>
    %cst_58 = arith.constant 9.99999974E-6 : f32
    %133 = vector.broadcast %cst_58 : f32 to vector<8x1xf32>
    %134 = arith.addf %132, %133 : vector<8x1xf32>
    %135 = math.rsqrt %134 : vector<8x1xf32>
    %136 = vector.broadcast %129 : vector<8x1xf32> to vector<8x256xf32>
    %137 = arith.subf %121, %136 : vector<8x256xf32>
    %138 = vector.broadcast %135 : vector<8x1xf32> to vector<8x256xf32>
    %139 = arith.mulf %137, %138 : vector<8x256xf32>
    %140 = vector.broadcast %4 : vector<8x1xf32> to vector<8x256xf32>
    %141 = arith.mulf %139, %140 : vector<8x256xf32>
    %142 = vector.broadcast %5 : vector<8x1xf32> to vector<8x256xf32>
    %143 = arith.addf %141, %142 : vector<8x256xf32>
    %cst_59 = arith.constant 0.000000e+00 : f32
    %144 = vector.broadcast %cst_59 : f32 to vector<8x256xf32>
    %145 = arith.maximumf %143, %144 : vector<8x256xf32>
    %c17_i32_60 = arith.constant 17 : i32
    %146 = tpu.dynamic_rotate %145 by %c17_i32_60 dim 1 : vector<8x256xf32>, i32 -> vector<8x256xf32>
    %c16_i32_61 = arith.constant 16 : i32
    %147 = tpu.dynamic_rotate %145 by %c16_i32_61 dim 1 : vector<8x256xf32>, i32 -> vector<8x256xf32>
    %c15_i32_62 = arith.constant 15 : i32
    %148 = tpu.dynamic_rotate %145 by %c15_i32_62 dim 1 : vector<8x256xf32>, i32 -> vector<8x256xf32>
    %c1_i32_63 = arith.constant 1 : i32
    %149 = tpu.dynamic_rotate %145 by %c1_i32_63 dim 1 : vector<8x256xf32>, i32 -> vector<8x256xf32>
    %c255_i32_64 = arith.constant 255 : i32
    %150 = tpu.dynamic_rotate %145 by %c255_i32_64 dim 1 : vector<8x256xf32>, i32 -> vector<8x256xf32>
    %c241_i32_65 = arith.constant 241 : i32
    %151 = tpu.dynamic_rotate %145 by %c241_i32_65 dim 1 : vector<8x256xf32>, i32 -> vector<8x256xf32>
    %c240_i32_66 = arith.constant 240 : i32
    %152 = tpu.dynamic_rotate %145 by %c240_i32_66 dim 1 : vector<8x256xf32>, i32 -> vector<8x256xf32>
    %c239_i32_67 = arith.constant 239 : i32
    %153 = tpu.dynamic_rotate %145 by %c239_i32_67 dim 1 : vector<8x256xf32>, i32 -> vector<8x256xf32>
    %154 = tpu.concatenate %146, %147, %148, %149, %145, %150, %151, %152, %153 in 0 : vector<8x256xf32>, vector<8x256xf32>, vector<8x256xf32>, vector<8x256xf32>, vector<8x256xf32>, vector<8x256xf32>, vector<8x256xf32>, vector<8x256xf32>, vector<8x256xf32> -> vector<72x256xf32>
    %155 = arith.mulf %154, %14 : vector<72x256xf32>
    %cst_68 = arith.constant dense<0.000000e+00> : vector<8x256xf32>
    %156 = tpu.matmul %1, %155, %cst_68 {dimension_numbers = #tpu.dot_dimension_numbers<[1], [0], [0], [1], [0, 0, 1, 1], [], []>} : vector<8x72xf32>, vector<72x256xf32>, vector<8x256xf32> -> vector<8x256xf32>
    %157 = vector.broadcast %6 : vector<8x1xf32> to vector<8x256xf32>
    %158 = arith.addf %156, %157 : vector<8x256xf32>
    %cst_69 = arith.constant dense<0.000000e+00> : vector<8xf32>
    %159 = vector.multi_reduction <add>, %158, %cst_69 [1] : vector<8x256xf32> to vector<8xf32>
    %160 = vector.shape_cast %159 : vector<8xf32> to vector<8x1xf32>
    %161 = arith.mulf %158, %158 : vector<8x256xf32>
    %cst_70 = arith.constant dense<0.000000e+00> : vector<8xf32>
    %162 = vector.multi_reduction <add>, %161, %cst_70 [1] : vector<8x256xf32> to vector<8xf32>
    %163 = vector.shape_cast %162 : vector<8xf32> to vector<8x1xf32>
    %164 = tpu.concatenate %160, %163 in 0 : vector<8x1xf32>, vector<8x1xf32> -> vector<16x1xf32>
    %cst_71 = arith.constant dense<0.000000e+00> : vector<16x1xf32>
    %165 = tpu.matmul %12, %164, %cst_71 {dimension_numbers = #tpu.dot_dimension_numbers<[1], [0], [0], [1], [0, 0, 1, 1], [], []>} : vector<16x16xf32>, vector<16x1xf32>, vector<16x1xf32> -> vector<16x1xf32>
    %166 = vector.extract_strided_slice %165 {offsets = [0, 0], sizes = [8, 1], strides = [1, 1]} : vector<16x1xf32> to vector<8x1xf32>
    %167 = vector.extract_strided_slice %165 {offsets = [8, 0], sizes = [8, 1], strides = [1, 1]} : vector<16x1xf32> to vector<8x1xf32>
    %168 = arith.mulf %166, %166 : vector<8x1xf32>
    %169 = arith.subf %167, %168 : vector<8x1xf32>
    %cst_72 = arith.constant 9.99999974E-6 : f32
    %170 = vector.broadcast %cst_72 : f32 to vector<8x1xf32>
    %171 = arith.addf %169, %170 : vector<8x1xf32>
    %172 = math.rsqrt %171 : vector<8x1xf32>
    %173 = vector.broadcast %166 : vector<8x1xf32> to vector<8x256xf32>
    %174 = arith.subf %158, %173 : vector<8x256xf32>
    %175 = vector.broadcast %172 : vector<8x1xf32> to vector<8x256xf32>
    %176 = arith.mulf %174, %175 : vector<8x256xf32>
    %177 = vector.broadcast %7 : vector<8x1xf32> to vector<8x256xf32>
    %178 = arith.mulf %176, %177 : vector<8x256xf32>
    %179 = vector.broadcast %8 : vector<8x1xf32> to vector<8x256xf32>
    %180 = arith.addf %178, %179 : vector<8x256xf32>
    %cst_73 = arith.constant 0.000000e+00 : f32
    %181 = vector.broadcast %cst_73 : f32 to vector<8x256xf32>
    %182 = arith.maximumf %180, %181 : vector<8x256xf32>
    %cst_74 = arith.constant dense<0.000000e+00> : vector<32x256xf32>
    %183 = tpu.matmul %2, %182, %cst_74 {dimension_numbers = #tpu.dot_dimension_numbers<[1], [0], [0], [1], [0, 0, 1, 1], [], []>} : vector<32x8xf32>, vector<8x256xf32>, vector<32x256xf32> -> vector<32x256xf32>
    %184 = vector.broadcast %9 : vector<32x1xf32> to vector<32x256xf32>
    %185 = arith.addf %183, %184 : vector<32x256xf32>
    %cst_75 = arith.constant dense<0.000000e+00> : vector<32xf32>
    %186 = vector.multi_reduction <add>, %185, %cst_75 [1] : vector<32x256xf32> to vector<32xf32>
    %187 = vector.shape_cast %186 : vector<32xf32> to vector<32x1xf32>
    %188 = arith.mulf %185, %185 : vector<32x256xf32>
    %cst_76 = arith.constant dense<0.000000e+00> : vector<32xf32>
    %189 = vector.multi_reduction <add>, %188, %cst_76 [1] : vector<32x256xf32> to vector<32xf32>
    %190 = vector.shape_cast %189 : vector<32xf32> to vector<32x1xf32>
    %191 = tpu.concatenate %187, %190 in 0 : vector<32x1xf32>, vector<32x1xf32> -> vector<64x1xf32>
    %cst_77 = arith.constant dense<0.000000e+00> : vector<64x1xf32>
    %192 = tpu.matmul %13, %191, %cst_77 {dimension_numbers = #tpu.dot_dimension_numbers<[1], [0], [0], [1], [0, 0, 1, 1], [], []>} : vector<64x64xf32>, vector<64x1xf32>, vector<64x1xf32> -> vector<64x1xf32>
    %193 = vector.extract_strided_slice %192 {offsets = [0, 0], sizes = [32, 1], strides = [1, 1]} : vector<64x1xf32> to vector<32x1xf32>
    %194 = vector.extract_strided_slice %192 {offsets = [32, 0], sizes = [32, 1], strides = [1, 1]} : vector<64x1xf32> to vector<32x1xf32>
    %195 = arith.mulf %193, %193 : vector<32x1xf32>
    %196 = arith.subf %194, %195 : vector<32x1xf32>
    %cst_78 = arith.constant 9.99999974E-6 : f32
    %197 = vector.broadcast %cst_78 : f32 to vector<32x1xf32>
    %198 = arith.addf %196, %197 : vector<32x1xf32>
    %199 = math.rsqrt %198 : vector<32x1xf32>
    %200 = vector.broadcast %193 : vector<32x1xf32> to vector<32x256xf32>
    %201 = arith.subf %185, %200 : vector<32x256xf32>
    %202 = vector.broadcast %199 : vector<32x1xf32> to vector<32x256xf32>
    %203 = arith.mulf %201, %202 : vector<32x256xf32>
    %204 = vector.broadcast %10 : vector<32x1xf32> to vector<32x256xf32>
    %205 = arith.mulf %203, %204 : vector<32x256xf32>
    %206 = vector.broadcast %11 : vector<32x1xf32> to vector<32x256xf32>
    %207 = arith.addf %205, %206 : vector<32x256xf32>
    %cst_79 = arith.constant 0.000000e+00 : f32
    %208 = vector.broadcast %cst_79 : f32 to vector<32x256xf32>
    %209 = arith.maximumf %207, %208 : vector<32x256xf32>
    %210 = arith.addf %118, %209 : vector<32x256xf32>
    %cst_80 = arith.constant 0.000000e+00 : f32
    %211 = vector.broadcast %cst_80 : f32 to vector<32x256xf32>
    %212 = arith.maximumf %210, %211 : vector<32x256xf32>
    %213 = arith.index_cast %c1_i32_51 : i32 to index
    %c0_81 = arith.constant 0 : index
    %c0_82 = arith.constant 0 : index
    %214 = vector.load %arg17[%213, %c0_81, %c0_82] : memref<2x32x256xf32, #tpu.memory_space<vmem>>, vector<1x32x256xf32>
    %215 = vector.shape_cast %214 : vector<1x32x256xf32> to vector<32x256xf32>
    %216 = vector.shape_cast %212 : vector<32x256xf32> to vector<1x32x256xf32>
    tpu.vector_store %arg17[%213, %c0_81, %c0_82], %216 {strides = array<i32>} : memref<2x32x256xf32, #tpu.memory_space<vmem>>, vector<1x32x256xf32>,
    %c2_i32 = arith.constant 2 : i32
    return
  }
  func.func @transform_0(%arg0: i32) -> (i32, i32, i32) {
    %c0_i32 = arith.constant 0 : i32
    %c0_i32_0 = arith.constant 0 : i32
    %c0_i32_1 = arith.constant 0 : i32
    return %arg0, %c0_i32, %c0_i32_0 : i32, i32, i32
  }
  func.func @transform_1(%arg0: i32) -> (i32, i32) {
    %c0_i32 = arith.constant 0 : i32
    %c0_i32_0 = arith.constant 0 : i32
    %c0_i32_1 = arith.constant 0 : i32
    return %c0_i32, %c0_i32_0 : i32, i32
  }
  func.func @transform_2(%arg0: i32) -> (i32, i32) {
    %c0_i32 = arith.constant 0 : i32
    %c0_i32_0 = arith.constant 0 : i32
    %c0_i32_1 = arith.constant 0 : i32
    return %c0_i32, %c0_i32_0 : i32, i32
  }
  func.func @transform_3(%arg0: i32) -> (i32, i32) {
    %c0_i32 = arith.constant 0 : i32
    %c0_i32_0 = arith.constant 0 : i32
    %c0_i32_1 = arith.constant 0 : i32
    return %c0_i32, %c0_i32_0 : i32, i32
  }
  func.func @transform_4(%arg0: i32) -> (i32, i32) {
    %c0_i32 = arith.constant 0 : i32
    %c0_i32_0 = arith.constant 0 : i32
    %c0_i32_1 = arith.constant 0 : i32
    return %c0_i32, %c0_i32_0 : i32, i32
  }
  func.func @transform_5(%arg0: i32) -> (i32, i32) {
    %c0_i32 = arith.constant 0 : i32
    %c0_i32_0 = arith.constant 0 : i32
    %c0_i32_1 = arith.constant 0 : i32
    return %c0_i32, %c0_i32_0 : i32, i32
  }
  func.func @transform_6(%arg0: i32) -> (i32, i32) {
    %c0_i32 = arith.constant 0 : i32
    %c0_i32_0 = arith.constant 0 : i32
    %c0_i32_1 = arith.constant 0 : i32
    return %c0_i32, %c0_i32_0 : i32, i32
  }
  func.func @transform_7(%arg0: i32) -> (i32, i32) {
    %c0_i32 = arith.constant 0 : i32
    %c0_i32_0 = arith.constant 0 : i32
    %c0_i32_1 = arith.constant 0 : i32
    return %c0_i32, %c0_i32_0 : i32, i32
  }
  func.func @transform_8(%arg0: i32) -> (i32, i32) {
    %c0_i32 = arith.constant 0 : i32
    %c0_i32_0 = arith.constant 0 : i32
    %c0_i32_1 = arith.constant 0 : i32
    return %c0_i32, %c0_i32_0 : i32, i32
  }
  func.func @transform_9(%arg0: i32) -> (i32, i32) {
    %c0_i32 = arith.constant 0 : i32
    %c0_i32_0 = arith.constant 0 : i32
    %c0_i32_1 = arith.constant 0 : i32
    return %c0_i32, %c0_i32_0 : i32, i32
  }
  func.func @transform_10(%arg0: i32) -> (i32, i32) {
    %c0_i32 = arith.constant 0 : i32
    %c0_i32_0 = arith.constant 0 : i32
    %c0_i32_1 = arith.constant 0 : i32
    return %c0_i32, %c0_i32_0 : i32, i32
  }
  func.func @transform_11(%arg0: i32) -> (i32, i32) {
    %c0_i32 = arith.constant 0 : i32
    %c0_i32_0 = arith.constant 0 : i32
    %c0_i32_1 = arith.constant 0 : i32
    return %c0_i32, %c0_i32_0 : i32, i32
  }
  func.func @transform_12(%arg0: i32) -> (i32, i32) {
    %c0_i32 = arith.constant 0 : i32
    %c0_i32_0 = arith.constant 0 : i32
    %c0_i32_1 = arith.constant 0 : i32
    return %c0_i32, %c0_i32_0 : i32, i32
  }
  func.func @transform_13(%arg0: i32) -> (i32, i32) {
    %c0_i32 = arith.constant 0 : i32
    %c0_i32_0 = arith.constant 0 : i32
    %c0_i32_1 = arith.constant 0 : i32
    return %c0_i32, %c0_i32_0 : i32, i32
  }
  func.func @transform_14(%arg0: i32) -> (i32, i32) {
    %c0_i32 = arith.constant 0 : i32
    %c0_i32_0 = arith.constant 0 : i32
    %c0_i32_1 = arith.constant 0 : i32
    return %c0_i32, %c0_i32_0 : i32, i32
  }
  func.func @transform_15(%arg0: i32) -> (i32, i32) {
    %c0_i32 = arith.constant 0 : i32
    %c0_i32_0 = arith.constant 0 : i32
    %c0_i32_1 = arith.constant 0 : i32
    return %c0_i32, %c0_i32_0 : i32, i32
  }
  func.func @transform_16(%arg0: i32) -> (i32, i32, i32) {
    %c0_i32 = arith.constant 0 : i32
    %c0_i32_0 = arith.constant 0 : i32
    %c0_i32_1 = arith.constant 0 : i32
    return %arg0, %c0_i32, %c0_i32_0 : i32, i32, i32
  }
}

</mosaic_0001>

<bundles_post_ra>
// kernel: tpu_custom_call.1
= control target key start
LH: loop header
LB: loop body
LE: loop exit
PB: predicated region body
PF: predicated region fallthrough
CT: control target
= control target key end

     0   :  { %s3125_s0 = inlined_call_operand.hbm [shape: f32[2,32,256], index: 0, kind: input, shape index: {}]   ;;  %s3126_s1 = inlined_call_operand.vmem [shape: f32[8,32], index: 1, kind: input, shape index: {}]   ;;  %s3127_s2 = inlined_call_operand.vmem [shape: f32[8,1], index: 2, kind: input, shape index: {}]   ;;  %s3128_s3 = inlined_call_operand.vmem [shape: f32[8,1], index: 3, kind: input, shape index: {}]   ;;  %s3129_s4 = inlined_call_operand.vmem [shape: f32[8,1], index: 4, kind: input, shape index: {}]   ;;  %s3130_s5 = inlined_call_operand.vmem [shape: f32[16,16], index: 5, kind: input, shape index: {}]   ;;  %s3131_s6 = inlined_call_operand.vmem [shape: f32[8,72], index: 6, kind: input, shape index: {}]   ;;  %s3132_s7 = inlined_call_operand.vmem [shape: f32[8,1], index: 7, kind: input, shape index: {}]   ;;  %s3133_s8 = inlined_call_operand.vmem [shape: f32[8,1], index: 8, kind: input, shape index: {}]   ;;  %s3134_s9 = inlined_call_operand.vmem [shape: f32[8,1], index: 9, kind: input, shape index: {}]   ;;  %s3135_s10 = inlined_call_operand.vmem [shape: f32[32,8], index: 10, kind: input, shape index: {}]   ;;  %s3136_s11 = inlined_call_operand.vmem [shape: f32[32,1], index: 11, kind: input, shape index: {}]   ;;  %s3137_s12 = inlined_call_operand.vmem [shape: f32[32,1], index: 12, kind: input, shape index: {}]   ;;  %s3138_s13 = inlined_call_operand.vmem [shape: f32[32,1], index: 13, kind: input, shape index: {}]   ;;  %s3139_s14 = inlined_call_operand.vmem [shape: f32[64,64], index: 14, kind: input, shape index: {}]   ;;  %s3140_s15 = inlined_call_operand.vmem [shape: f32[72,256], index: 15, kind: input, shape index: {}]   ;;  %s3141_s16 = inlined_call_operand.hbm [shape: f32[2,32,256], index: 16, kind: output, shape index: {}]  }
   0x1   :  { %3150 = sst [smem:[#allocation13_spill]] %s3125_s0 }
   0x2   :  { %21 = vsyncpa [#allocation3], 0 }
   0x3   :  { %22 = vsyncpa [#allocation4], 0  ;;  %s2211_s21 = smov [#allocation2]   ;;  %s3151_s25 = sld [smem:[#allocation13_spill]] }
   0x4   :  { %s28_s22 = sshll.u32 %s2211_s21, 4  ;;  %s29_s22 = int_to_ptr.vmem [resolvable:$true] %s28_s22 }
   0x9   :  { %s2163_s26 = scalar_lea.hbm %s3151_s25, 2048 }
   0xa   :  { %p2164_p0 = scmp.ne.s32.totalorder %s3151_s25, %s2163_s26  ;;  %p2167_p1 = scmp.lt.u32.totalorder %s2163_s26, %s3151_s25 }
   0xc   :  { %p2169_p2 = pnand %p2167_p1, %p2164_p0 }
   0xe   :  { %2172 = shalt.err (!%p2169_p2)
}
   0xf   :  { %s2173_s0 = scalar_lea.vmem %s29_s22, 2048  ;;  %p2178_p4 = scmp.lt.s32.totalorder %s29_s22, %s29_s22 }
  0x10   :  { %p2174_p3 = scmp.ne.s32.totalorder %s29_s22, %s2173_s0  ;;  %p2179_p5 = scmp.lt.s32.totalorder %s2173_s0, %s2173_s0 }
  0x12   :  { %p2180_p6 = por %p2179_p5, %p2178_p4 }
  0x14   :  { %p2181_p7 = pnand %p2180_p6, %p2174_p3 }
  0x16   :  { %2184 = shalt.err (!%p2181_p7)
}
  0x17   :  { %s2212_s17 = smov 256   ;;  %s2213_s18 = smov 16  }
  0x18   :  { %34 = dma.hbm_to_vmem [thread:$0]  %s3151_s25, 2048, %s29_s22, [#allocation3], %s2212_s17, %s2212_s17, %s2213_s18  }
  0x19   :  { %2207 = dma.done.wait [#allocation3], 2048  }
  0x1a   :  { %2208 = vsyncadd [#allocation3], 4294965248  ;;  %v3143_v0 = vmov 0.0   ;;  %v2215_v1 = vmov 0   ;;  %v121_v2 = vld [vmem:[#allocation2 + $0x8] sm:$0xff]  ;;  %v123_v3 = vld [vmem:[#allocation2 + $0x18] sm:$0xff]  ;;  %v336_v53 = vlaneseq }
  0x1b   :  { %201 = vmatprep.mubr.f32.mxu0 %v3143_v0  ;;  %2121 = vset.pattern.permute.xlu0 %v2215_v1  ;;  %v120_v4 = vld [vmem:[#allocation2] sm:$0xff]  ;;  %v2012_v5 = vpack.c.bf16 %v123_v3, %v121_v2  ;;  %v122_v6 = vld [vmem:[#allocation2 + $0x10] sm:$0xff]  ;;  %v125_v7 = vld [vmem:[#allocation2 + $0x28] sm:$0xff]  ;;  %vm133_vm0 = vcmask 261120   ;;  %vm216_vm1 = vcmask 130048   ;;  %s2218_s30 = smov 127  }
  0x1c   :  { %2122 = vset.pattern.permute.xlu1 %v2215_v1  ;;  %481 = vmatprep.mubr.f32.mxu1 %v3143_v0  ;;  %v127_v8 = vld [vmem:[#allocation2 + $0x38] sm:$0xff]  ;;  %v2014_v9 = vpack.c.bf16 %v122_v6, %v120_v4  ;;  %v124_v11 = vld [vmem:[#allocation2 + $0x20] sm:$0xff]  ;;  %v126_v12 = vld [vmem:[#allocation2 + $0x30] sm:$0xff]  ;;  %s2219_s0 = smov 113   ;;  %s2220_s19 = smov 15   ;;  %v2409_v54 = vand.u32 127, %v336_v53 }
  0x1d   :  { %v2016_v10 = vpack.c.bf16 %v127_v8, %v125_v7  ;;  %2013 = vmatprep.subr.bf16.mxu0 %v2012_v5  ;;  %v74_v13 = vld [vmem:[%s3127_s2] sm:$0xff]  ;;  %v2018_v14 = vpack.c.bf16 %v126_v12, %v124_v11  ;;  %v2353_v30 = vld [vmem:[%s3130_s5 + $0x8] sm:$0xff]  ;;  %s2221_s20 = smov 112   ;;  %s2222_s21 = smov 111   ;;  %v2425_v61 = vld [vmem:[%s3140_s15 + $0x10] sm:$0xff]  ;;  %vm413_vm10 = vcmask 588800  }
  0x1e   :  { %2015 = vmatpush1.bf16.msra.mxu0 %v2014_v9  ;;  %130 = vperm.xlu0 %2121, %v74_v13   ;;  %v2332_v15 = vld [vmem:[%s3126_s1] sm:$0xff]  ;;  %vm338_vm2 = vcmp.lt.s32.totalorder %v2409_v54, 17  ;;  %vm345_vm3 = vcmp.lt.s32.totalorder %v2409_v54, 16  ;;  %v2430_v62 = vld [vmem:[%s3140_s15 + $0x8] sm:$0xff]  ;;  %v2435_v63 = vld [vmem:[%s3140_s15 + $0x18] sm:$0xff]  ;;  %vm352_vm4 = vcmp.lt.s32.totalorder %v2409_v54, 15 }
  0x1f   :  { %2017 = vmatprep.subr.bf16.mxu0 %v2016_v10  ;;  %v2343_v25 = vld [vmem:[%s3130_s5] sm:$0xff]  ;;  %s2217_s5 = smov 1   ;;  %vm359_vm5 = vcmp.lt.s32.totalorder %v2409_v54, 1  ;;  %vm366_vm6 = vcmp.lt.s32.totalorder %v2409_v54, 127  ;;  %vm373_vm7 = vcmp.lt.s32.totalorder %v2409_v54, 113  ;;  %vm380_vm8 = vcmp.lt.s32.totalorder %v2409_v54, 112 }
  0x20   :  { %v75_v26 = vld [vmem:[%s3128_s3] sm:$0xff]  ;;  %vm387_vm9 = vcmp.lt.s32.totalorder %v2409_v54, 111  ;;  %vm625_vm11 = vcmask 64512   ;;  %vm759_vm12 = vcmask 523264  }
  0x21   :  { %v76_v37 = vld [vmem:[%s3129_s4] sm:$0xff]  ;;  %s2216_s4 = smov 17  }
  0x22   :  { %2019 = vmatpush1.bf16.msra.mxu0 %v2018_v14  ;;  %v77_v52 = vld [vmem:[%s3132_s7] sm:$0xff] }
  0x23   :  { %v2415_v58 = vld [vmem:[%s3140_s15] sm:$0xff] }
  0x24   :  { %v2449_v14 = vld [vmem:[%s3140_s15 + $0x20] sm:$0xff] }
  0x25   :  { %1844 = vmatmul.mubr.msk.f32.vlgmr.msra.gmra.mrb[0].mxu0 %vm133_vm0, %v2332_v15  ;;  %v2514_v53 = vld [vmem:[%s3140_s15 + $0x60] sm:$0xff] }
  0x26   :  { %1932 = vmatprep.mubr.msk.f32.mxu0 %vm216_vm1, %v2343_v25 }
  0x9d   :  { %v2336_v16 = vpop.permute.xlu0 %130 }
  0xf8   :  { %v203_v17 = vpop.f32.mrb[0].mxu0 }
  0xf9   :  { %v204_v18 = vadd.f32 %v203_v17, %v2336_v16  ;;  %v205_v19 = vpop.f32.mrb[1].mxu0  ;;  %v2455_v17 = vld [vmem:[%s3140_s15 + $0x28] sm:$0xff] }
  0xfa   :  { %v206_v20 = vadd.f32 %v205_v19, %v2336_v16 }
  0xfb   :  { %v211_v21 = vmul.f32 %v204_v18, %v204_v18 }
  0xfc   :  { %v208_v22 = vadd.f32 %v206_v20, %v204_v18  ;;  %v212_v23 = vmul.f32 %v206_v20, %v206_v20 }
  0xfe   :  { %209 = vadd.xlane.f32.xlu0 %v208_v22  ;;  %v213_v24 = vadd.f32 %v212_v23, %v211_v21  ;;  %v2469_v21 = vld [vmem:[%s3140_s15 + $0x38] sm:$0xff] }
 0x100   :  { %214 = vadd.xlane.f32.xlu1 %v213_v24 }
 0x111   :  { %318 = vperm.xlu1 %2122, %v75_v26  }
 0x18b   :  { %v210_v27 = vpop.xlane.xlu0 %209 }
 0x18d   :  { %v215_v28 = vpop.xlane.xlu1 %214 }
 0x18e   :  { %v2020_v29 = vpack.c.bf16 %v215_v28, %v210_v27 }
 0x190   :  { %2021 = vmatprep.subr.bf16.mxu0 %v2020_v29 }
 0x191   :  { %2023 = vmatpush3.bf16.msra.mxu0 %v2020_v29  ;;  %v2362_v38 = vpop.permute.xlu1 %318 }
 0x194   :  { %1933 = vmatmul.mubr.msk.f32.vlgmr.msra.gmra.mrb[2].mxu0 %vm216_vm1, %v2353_v30 }
 0x195   :  { %1939 = vmatprep.mubr.msk.f32.mxu0 %vm216_vm1, %v2343_v25 }
 0x267   :  { %v1934_v31 = vpop.f32.mrb[2].mxu0 }
 0x268   :  { %v289_v32 = vpop.f32.mrb[3].mxu0 }
 0x269   :  { %v298_v33 = vmul.f32 %v289_v32, %v289_v32  ;;  %304 = vperm.xlu1 %2122, %v289_v32   ;;  %v2488_v32 = vld [vmem:[%s3140_s15 + $0x50] sm:$0xff] }
 0x26b   :  { %v299_v34 = vsub.f32 %v1934_v31, %v298_v33  ;;  %v2483_v31 = vld [vmem:[%s3140_s15 + $0x48] sm:$0xff]  ;;  %v2493_v33 = vld [vmem:[%s3140_s15 + $0x58] sm:$0xff] }
 0x26d   :  { %v300_v35 = vadd.f32 1e-05, %v299_v34  ;;  %v2498_v34 = vld [vmem:[%s3140_s15 + $0x40] sm:$0xff] }
 0x26f   :  { %2123 = vrsqrt.f32 %v300_v35 }
 0x279   :  { %v2124_v36 = vpop.eup %2123 }
 0x27a   :  { %311 = vperm.xlu1 %2122, %v2124_v36  }
 0x27e   :  { %325 = vperm.xlu1 %2122, %v76_v37  }
 0x2e8   :  { %v305_v39 = vpop.permute.xlu1 %304 }
 0x2e9   :  { %v307_v40 = vsub.f32 %v204_v18, %v305_v39  ;;  %v308_v41 = vsub.f32 %v206_v20, %v305_v39  ;;  %v2464_v20 = vld [vmem:[%s3140_s15 + $0x30] sm:$0xff] }
 0x2f9   :  { %v312_v42 = vpop.permute.xlu1 %311 }
 0x2fa   :  { %v314_v43 = vmul.f32 %v312_v42, %v307_v40  ;;  %v315_v44 = vmul.f32 %v312_v42, %v308_v41 }
 0x2fc   :  { %v321_v45 = vmul.f32 %v2362_v38, %v314_v43  ;;  %v322_v46 = vmul.f32 %v2362_v38, %v315_v44 }
 0x2fd   :  { %v2366_v47 = vpop.permute.xlu1 %325 }
 0x2fe   :  { %v328_v48 = vadd.f32 %v2366_v47, %v321_v45  ;;  %v329_v49 = vadd.f32 %v2366_v47, %v322_v46 }
 0x300   :  { %v2370_v50 = vmax.f32 %v328_v48, 0.0  ;;  %v2372_v51 = vmax.f32 %v329_v49, 0.0 }
 0x302   :  { %334 = vrot.lane.b32.xlu0 %v2372_v51, %s2216_s4  ;;  %332 = vrot.lane.b32.xlu1 %v2370_v50, %s2216_s4  ;;  %v399_v44 = vmul.f32 %v2372_v51, %v2483_v31  ;;  %v398_v45 = vmul.f32 %v2370_v50, %v2498_v34 }
 0x306   :  { %357 = vrot.lane.b32.xlu0 %v2372_v51, %s2217_s5  ;;  %341 = vrot.lane.b32.xlu1 %v2370_v50, %s2213_s18 }
 0x30a   :  { %364 = vrot.lane.b32.xlu0 %v2372_v51, %s2218_s30  ;;  %343 = vrot.lane.b32.xlu1 %v2372_v51, %s2213_s18 }
 0x30e   :  { %371 = vrot.lane.b32.xlu0 %v2372_v51, %s2219_s0  ;;  %348 = vrot.lane.b32.xlu1 %v2370_v50, %s2220_s19 }
 0x312   :  { %378 = vrot.lane.b32.xlu0 %v2372_v51, %s2221_s20  ;;  %350 = vrot.lane.b32.xlu1 %v2372_v51, %s2220_s19 }
 0x316   :  { %385 = vrot.lane.b32.xlu0 %v2372_v51, %s2222_s21  ;;  %355 = vrot.lane.b32.xlu1 %v2370_v50, %s2217_s5  ;;  %v2520_v51 = vld [vmem:[%s3140_s15 + $0x68] sm:$0xff] }
 0x31a   :  { %362 = vrot.lane.b32.xlu1 %v2370_v50, %s2218_s30 }
 0x31e   :  { %369 = vrot.lane.b32.xlu1 %v2370_v50, %s2219_s0 }
 0x322   :  { %376 = vrot.lane.b32.xlu1 %v2370_v50, %s2221_s20 }
 0x326   :  { %383 = vrot.lane.b32.xlu1 %v2370_v50, %s2222_s21 }
 0x32a   :  { %410 = vperm.xlu1 %2122, %v77_v52  }
 0x374   :  { %v333_v55 = vpop.permute.xlu1 %332  ;;  %v335_v56 = vpop.permute.xlu0 %334 }
 0x375   :  { %v339_v59 = vsel %vm338_vm2, %v333_v55, %v335_v56  ;;  %v340_v60 = vsel %vm338_vm2, %v335_v56, %v333_v55  ;;  %v2529_v56 = vld [vmem:[%s3140_s15 + $0x70] sm:$0xff] }
 0x376   :  { %v390_v4 = vmul.f32 %v340_v60, %v2415_v58  ;;  %v391_v6 = vmul.f32 %v339_v59, %v2430_v62 }
 0x378   :  { %v342_v57 = vpop.permute.xlu1 %341  ;;  %v358_v8 = vpop.permute.xlu0 %357 }
 0x37c   :  { %v344_v1 = vpop.permute.xlu1 %343  ;;  %v365_v13 = vpop.permute.xlu0 %364 }
 0x37d   :  { %v346_v2 = vsel %vm345_vm3, %v342_v57, %v344_v1  ;;  %v347_v3 = vsel %vm345_vm3, %v344_v1, %v342_v57  ;;  %v2534_v57 = vld [vmem:[%s3140_s15 + $0x78] sm:$0xff] }
 0x37e   :  { %v392_v5 = vmul.f32 %v347_v3, %v2425_v61  ;;  %v393_v7 = vmul.f32 %v346_v2, %v2435_v63 }
 0x380   :  { %v349_v9 = vpop.permute.xlu1 %348  ;;  %v2024_v10 = vpack.c.bf16 %v393_v7, %v391_v6  ;;  %v2026_v11 = vpack.c.bf16 %v392_v5, %v390_v4  ;;  %v372_v35 = vpop.permute.xlu0 %371  ;;  %v2548_v6 = vld [vmem:[%s3140_s15 + $0x88] sm:$0xff] }
 0x382   :  { %2025 = vmatprep.subr.bf16.mxu1 %v2024_v10 }
 0x383   :  { %2027 = vmatpush1.bf16.msra.mxu1 %v2026_v11 }
 0x384   :  { %v351_v12 = vpop.permute.xlu1 %350  ;;  %v379_v52 = vpop.permute.xlu0 %378 }
 0x385   :  { %v353_v18 = vsel %vm352_vm4, %v349_v9, %v351_v12  ;;  %v354_v19 = vsel %vm352_vm4, %v351_v12, %v349_v9  ;;  %v1051_v12 = vld [vmem:[#allocation2 + $0x48] sm:$0xff] }
 0x386   :  { %v394_v26 = vmul.f32 %v354_v19, %v2449_v14  ;;  %v395_v27 = vmul.f32 %v353_v18, %v2455_v17  ;;  %v2555_v18 = vld [vmem:[%s3140_s15 + $0x80] sm:$0xff] }
 0x388   :  { %v356_v22 = vpop.permute.xlu1 %355  ;;  %v386_v7 = vpop.permute.xlu0 %385 }
 0x389   :  { %v360_v23 = vsel %vm359_vm5, %v356_v22, %v358_v8  ;;  %v361_v24 = vsel %vm359_vm5, %v358_v8, %v356_v22 }
 0x38a   :  { %v396_v28 = vmul.f32 %v361_v24, %v2464_v20  ;;  %v397_v29 = vmul.f32 %v360_v23, %v2469_v21  ;;  %v1050_v23 = vld [vmem:[#allocation2 + $0x40] sm:$0xff]  ;;  %v1052_v24 = vld [vmem:[#allocation2 + $0x50] sm:$0xff] }
 0x38c   :  { %v363_v36 = vpop.permute.xlu1 %362  ;;  %v2028_v37 = vpack.c.bf16 %v397_v29, %v395_v27  ;;  %v2030_v39 = vpack.c.bf16 %v396_v28, %v394_v26  ;;  %v1055_v26 = vld [vmem:[#allocation2 + $0x68] sm:$0xff]  ;;  %v1057_v27 = vld [vmem:[#allocation2 + $0x78] sm:$0xff] }
 0x38d   :  { %v367_v40 = vsel %vm366_vm6, %v363_v36, %v365_v13  ;;  %v368_v41 = vsel %vm366_vm6, %v365_v13, %v363_v36  ;;  %v1053_v13 = vld [vmem:[#allocation2 + $0x58] sm:$0xff]  ;;  %v2062_v36 = vpack.c.bf16 %v1052_v24, %v1050_v23  ;;  %v79_v24 = vld [vmem:[%s3134_s9] sm:$0xff] }
 0x38e   :  { %v400_v42 = vmul.f32 %v367_v40, %v2488_v32  ;;  %v401_v43 = vmul.f32 %v368_v41, %v2493_v33  ;;  %2029 = vmatprep.subr.bf16.mxu1 %v2028_v37  ;;  %v2060_v28 = vpack.c.bf16 %v1053_v13, %v1051_v12  ;;  %v2064_v37 = vpack.c.bf16 %v1057_v27, %v1055_v26  ;;  %v1056_v40 = vld [vmem:[#allocation2 + $0x70] sm:$0xff] }
 0x38f   :  { %2031 = vmatpush1.bf16.msra.mxu1 %v2030_v39  ;;  %v1054_v39 = vld [vmem:[#allocation2 + $0x60] sm:$0xff] }
 0x390   :  { %v370_v46 = vpop.permute.xlu1 %369  ;;  %v2032_v48 = vpack.c.bf16 %v401_v43, %v399_v44  ;;  %v2034_v49 = vpack.c.bf16 %v400_v42, %v398_v45  ;;  %v2066_v41 = vpack.c.bf16 %v1056_v40, %v1054_v39 }
 0x391   :  { %v374_v50 = vsel %vm373_vm7, %v370_v46, %v372_v35  ;;  %v375_v55 = vsel %vm373_vm7, %v372_v35, %v370_v46  ;;  %v2564_v35 = vld [vmem:[%s3131_s6] sm:$0xff] }
 0x392   :  { %2033 = vmatprep.subr.bf16.mxu1 %v2032_v48  ;;  %v402_v2 = vmul.f32 %v374_v50, %v2514_v53  ;;  %v403_v3 = vmul.f32 %v375_v55, %v2520_v51 }
 0x393   :  { %2035 = vmatpush1.bf16.msra.mxu1 %v2034_v49 }
 0x394   :  { %v377_v59 = vpop.permute.xlu1 %376 }
 0x395   :  { %v381_v60 = vsel %vm380_vm8, %v377_v59, %v379_v52  ;;  %v382_v1 = vsel %vm380_vm8, %v379_v52, %v377_v59 }
 0x396   :  { %v404_v4 = vmul.f32 %v381_v60, %v2529_v56  ;;  %v405_v5 = vmul.f32 %v382_v1, %v2534_v57 }
 0x398   :  { %v384_v8 = vpop.permute.xlu1 %383  ;;  %v2036_v9 = vpack.c.bf16 %v405_v5, %v403_v3  ;;  %v2038_v10 = vpack.c.bf16 %v404_v4, %v402_v2 }
 0x399   :  { %v389_v11 = vsel %vm387_vm9, %v386_v7, %v384_v8  ;;  %v388_v19 = vsel %vm387_vm9, %v384_v8, %v386_v7 }
 0x39a   :  { %v407_v22 = vmul.f32 %v389_v11, %v2548_v6  ;;  %2037 = vmatprep.subr.bf16.mxu1 %v2036_v9  ;;  %v406_v29 = vmul.f32 %v388_v19, %v2555_v18  ;;  %v78_v19 = vld [vmem:[%s3133_s8] sm:$0xff] }
 0x39b   :  { %2039 = vmatpush1.bf16.msra.mxu1 %v2038_v10 }
 0x39c   :  { %433 = vmatprep.subr.mxu1 %v407_v22 }
 0x39f   :  { %434 = vmatpush1.msra.mxu1 %v406_v29 }
 0x3a0   :  { %1847 = vmatmul.mubr.msk.f32.vlgmr.msra.gmra.mrb[0].mxu1 %vm413_vm10, %v2564_v35  ;;  %2061 = vmatprep.subr.bf16.mxu1 %v2060_v28  ;;  %v81_v28 = vld [vmem:[%s3136_s11 + $0x8] sm:$0xff] }
 0x3a1   :  { %2063 = vmatpush1.bf16.msra.mxu1 %v2062_v36  ;;  %1122 = vmatprep.mubr.f32.mxu1 %v3143_v0 }
 0x3a2   :  { %2065 = vmatprep.subr.bf16.mxu1 %v2064_v37  ;;  %v83_v37 = vld [vmem:[%s3136_s11 + $0x18] sm:$0xff] }
 0x3a5   :  { %2067 = vmatpush1.bf16.msra.mxu1 %v2066_v41  ;;  %v80_v41 = vld [vmem:[%s3136_s11] sm:$0xff] }
 0x3a8   :  { %1862 = vmatmul.mubr.msk.f32.vlgmr.msra.gmra.mrb[2].mxu1 %vm133_vm0, %v2332_v15 }
 0x3a9   :  { %1974 = vmatprep.mubr.msk.f32.mxu1 %vm216_vm1, %v2343_v25  ;;  %v2573_v42 = vpop.permute.xlu1 %410 }
 0x473   :  { %v483_v43 = vpop.f32.mrb[0].mxu1 }
 0x474   :  { %v2576_v44 = vadd.f32 %v483_v43, %v2573_v42  ;;  %v485_v45 = vpop.f32.mrb[1].mxu1  ;;  %v82_v43 = vld [vmem:[%s3136_s11 + $0x10] sm:$0xff] }
 0x475   :  { %v2579_v46 = vadd.f32 %v485_v45, %v2573_v42 }
 0x476   :  { %v491_v48 = vmul.f32 %v2576_v44, %v2576_v44 }
 0x477   :  { %v488_v49 = vadd.f32 %v2579_v46, %v2576_v44  ;;  %v492_v15 = vmul.f32 %v2579_v46, %v2579_v46 }
 0x479   :  { %489 = vadd.xlane.f32.xlu0 %v488_v49  ;;  %v493_v52 = vadd.f32 %v492_v15, %v491_v48 }
 0x47b   :  { %v1124_v50 = vpop.f32.mrb[2].mxu1  ;;  %494 = vadd.xlane.f32.xlu1 %v493_v52 }
 0x47c   :  { %v2588_v55 = vadd.f32 %v1124_v50, %v2336_v16  ;;  %v1126_v59 = vpop.f32.mrb[3].mxu1 }
 0x47d   :  { %v2591_v60 = vadd.f32 %v1126_v59, %v2336_v16 }
 0x47e   :  { %v1132_v2 = vmul.f32 %v2588_v55, %v2588_v55 }
 0x47f   :  { %v1129_v1 = vadd.f32 %v2591_v60, %v2588_v55  ;;  %v1133_v3 = vmul.f32 %v2591_v60, %v2591_v60 }
 0x481   :  { %1130 = vadd.xlane.f32.xlu0 %v1129_v1  ;;  %v1134_v4 = vadd.f32 %v1133_v3, %v1132_v2 }
 0x485   :  { %1135 = vadd.xlane.f32.xlu0 %v1134_v4 }
 0x506   :  { %v490_v5 = vpop.xlane.xlu0 %489 }
 0x508   :  { %v495_v7 = vpop.xlane.xlu1 %494 }
 0x509   :  { %v2040_v8 = vpack.c.bf16 %v495_v7, %v490_v5 }
 0x50b   :  { %2041 = vmatprep.subr.bf16.mxu0 %v2040_v8 }
 0x50c   :  { %2043 = vmatpush3.bf16.msra.mxu0 %v2040_v8 }
 0x50e   :  { %v1131_v9 = vpop.xlane.xlu0 %1130 }
 0x50f   :  { %1940 = vmatmul.mubr.msk.f32.vlgmr.msra.gmra.mrb[4].mxu0 %vm216_vm1, %v2353_v30 }
 0x510   :  { %702 = vmatprep.mubr.f32.mxu0 %v3143_v0 }
 0x512   :  { %v1136_v16 = vpop.xlane.xlu0 %1135 }
 0x513   :  { %v2068_v10 = vpack.c.bf16 %v1136_v16, %v1131_v9 }
 0x515   :  { %2069 = vmatprep.subr.bf16.mxu1 %v2068_v10 }
 0x516   :  { %2071 = vmatpush3.bf16.msra.mxu1 %v2068_v10 }
 0x519   :  { %1975 = vmatmul.mubr.msk.f32.vlgmr.msra.gmra.mrb[4].mxu1 %vm216_vm1, %v2353_v30 }
 0x51a   :  { %1544 = vmatprep.mubr.f32.mxu1 %v3143_v0 }
 0x5e2   :  { %v1941_v11 = vpop.f32.mrb[4].mxu0 }
 0x5e3   :  { %v562_v12 = vpop.f32.mrb[5].mxu0 }
 0x5e4   :  { %v571_v13 = vmul.f32 %v562_v12, %v562_v12  ;;  %577 = vperm.xlu1 %2122, %v562_v12  }
 0x5e6   :  { %v572_v22 = vsub.f32 %v1941_v11, %v571_v13  ;;  %v2652_v13 = vld [vmem:[%s3135_s10 + $0x8] sm:$0xff] }
 0x5e8   :  { %v573_v23 = vadd.f32 1e-05, %v572_v22  ;;  %591 = vperm.xlu1 %2122, %v78_v19  }
 0x5ea   :  { %2125 = vrsqrt.f32 %v573_v23 }
 0x5ec   :  { %598 = vperm.xlu1 %2122, %v79_v24   ;;  %v1976_v26 = vpop.f32.mrb[4].mxu1 }
 0x5ed   :  { %v1203_v27 = vpop.f32.mrb[5].mxu1 }
 0x5ee   :  { %v1212_v29 = vmul.f32 %v1203_v27, %v1203_v27 }
 0x5f0   :  { %v1213_v36 = vsub.f32 %v1976_v26, %v1212_v29  ;;  %612 = vperm.xlu1 %2122, %v81_v28  }
 0x5f2   :  { %v1214_v39 = vadd.f32 1e-05, %v1213_v36  ;;  %v2674_v36 = vld [vmem:[%s3135_s10 + $0x18] sm:$0xff] }
 0x5f4   :  { %v2126_v40 = vpop.eup %2125  ;;  %2127 = vrsqrt.f32 %v1214_v39  ;;  %622 = vperm.xlu1 %2122, %v83_v37  }
 0x5f5   :  { %584 = vperm.xlu0 %2121, %v2126_v40  }
 0x5f9   :  { %607 = vperm.xlu0 %2121, %v80_v41  }
 0x5fd   :  { %617 = vperm.xlu0 %2121, %v82_v43  }
 0x5fe   :  { %v2128_v45 = vpop.eup %2127 }
 0x5ff   :  { %1225 = vperm.xlu1 %2122, %v2128_v45  }
 0x601   :  { %1218 = vperm.xlu0 %2121, %v1203_v27   ;;  %v2662_v27 = vld [vmem:[%s3135_s10 + $0x10] sm:$0xff] }
 0x663   :  { %v578_v48 = vpop.permute.xlu1 %577 }
 0x664   :  { %v580_v52 = vsub.f32 %v2576_v44, %v578_v48  ;;  %v581_v50 = vsub.f32 %v2579_v46, %v578_v48  ;;  %v2642_v46 = vld [vmem:[%s3135_s10] sm:$0xff] }
 0x667   :  { %v2623_v49 = vpop.permute.xlu1 %591 }
 0x66b   :  { %v2625_v15 = vpop.permute.xlu1 %598 }
 0x66f   :  { %v2631_v5 = vpop.permute.xlu1 %612 }
 0x673   :  { %v2644_v11 = vpop.permute.xlu1 %622 }
 0x674   :  { %v585_v59 = vpop.permute.xlu0 %584 }
 0x675   :  { %v587_v1 = vmul.f32 %v585_v59, %v580_v52  ;;  %v588_v2 = vmul.f32 %v585_v59, %v581_v50 }
 0x677   :  { %v594_v3 = vmul.f32 %v2623_v49, %v587_v1  ;;  %v595_v4 = vmul.f32 %v2623_v49, %v588_v2 }
 0x678   :  { %v2633_v7 = vpop.permute.xlu0 %607 }
 0x679   :  { %v601_v8 = vadd.f32 %v2625_v15, %v594_v3  ;;  %v602_v9 = vadd.f32 %v2625_v15, %v595_v4 }
 0x67b   :  { %v603_v16 = vmax.f32 %v601_v8, 0.0  ;;  %v604_v10 = vmax.f32 %v602_v9, 0.0 }
 0x67c   :  { %v2637_v44 = vpop.permute.xlu0 %617 }
 0x67d   :  { %638 = vmatprep.subr.mxu0 %v604_v10 }
 0x67e   :  { %639 = vmatpush1.msra.mxu0 %v603_v16  ;;  %v1226_v23 = vpop.permute.xlu1 %1225 }
 0x67f   :  { %1850 = vmatmul.mubr.msk.f32.vlgmr.msra.gmra.mrb[6].mxu0 %vm625_vm11, %v2642_v46 }
 0x680   :  { %v1219_v12 = vpop.permute.xlu0 %1218  ;;  %708 = vmatprep.mubr.f32.mxu0 %v3143_v0 }
 0x681   :  { %v1221_v19 = vsub.f32 %v2588_v55, %v1219_v12  ;;  %v1222_v22 = vsub.f32 %v2591_v60, %v1219_v12 }
 0x683   :  { %v1228_v24 = vmul.f32 %v1226_v23, %v1221_v19  ;;  %v1229_v26 = vmul.f32 %v1226_v23, %v1222_v22  ;;  %1851 = vmatmul.mubr.msk.f32.gmra.mrb[8].mxu0 %vm625_vm11, %v2652_v13 }
 0x684   :  { %714 = vmatprep.mubr.f32.mxu0 %v3143_v0 }
 0x685   :  { %v1230_v28 = vmul.f32 %v1228_v24, %v2362_v38  ;;  %v1231_v29 = vmul.f32 %v1229_v26, %v2362_v38 }
 0x687   :  { %v1232_v55 = vadd.f32 %v1230_v28, %v2366_v47  ;;  %v1233_v60 = vadd.f32 %v1231_v29, %v2366_v47  ;;  %1852 = vmatmul.mubr.msk.f32.gmra.mrb[10].mxu0 %vm625_vm11, %v2662_v27 }
 0x688   :  { %720 = vmatprep.mubr.f32.mxu0 %v3143_v0 }
 0x689   :  { %v2676_v37 = vmax.f32 %v1232_v55, 0.0  ;;  %v2678_v39 = vmax.f32 %v1233_v60, 0.0 }
 0x68b   :  { %1853 = vmatmul.mubr.msk.f32.gmra.mrb[12].mxu0 %vm625_vm11, %v2674_v36  ;;  %1238 = vrot.lane.b32.xlu0 %v2678_v39, %s2216_s4 }
 0x68c   :  { %1236 = vrot.lane.b32.xlu1 %v2676_v37, %s2216_s4 }
 0x68f   :  { %1248 = vrot.lane.b32.xlu0 %v2676_v37, %s2220_s19 }
 0x690   :  { %1242 = vrot.lane.b32.xlu1 %v2676_v37, %s2213_s18 }
 0x693   :  { %1254 = vrot.lane.b32.xlu0 %v2676_v37, %s2217_s5 }
 0x694   :  { %1244 = vrot.lane.b32.xlu1 %v2678_v39, %s2213_s18 }
 0x697   :  { %1260 = vrot.lane.b32.xlu0 %v2676_v37, %s2218_s30 }
 0x698   :  { %1250 = vrot.lane.b32.xlu1 %v2678_v39, %s2220_s19 }
 0x69b   :  { %1266 = vrot.lane.b32.xlu0 %v2676_v37, %s2219_s0 }
 0x69c   :  { %1256 = vrot.lane.b32.xlu1 %v2678_v39, %s2217_s5 }
 0x6a0   :  { %1262 = vrot.lane.b32.xlu1 %v2678_v39, %s2218_s30 }
 0x6a4   :  { %1268 = vrot.lane.b32.xlu1 %v2678_v39, %s2219_s0 }
 0x752   :  { %v704_v38 = vpop.f32.mrb[6].mxu0 }
 0x753   :  { %v2707_v47 = vadd.f32 %v704_v38, %v2633_v7  ;;  %v706_v40 = vpop.f32.mrb[7].mxu0 }
 0x754   :  { %v2710_v41 = vadd.f32 %v706_v40, %v2633_v7 }
 0x755   :  { %3152 = vst [vmem:[#allocation8_spill] sm:$0xff] %v2707_v47  ;;  %v739_v43 = vmul.f32 %v2707_v47, %v2707_v47 }
 0x756   :  { %3153 = vst [vmem:[#allocation9_spill] sm:$0xff] %v2710_v41  ;;  %v710_v45 = vpop.f32.mrb[8].mxu0  ;;  %v727_v48 = vadd.f32 %v2710_v41, %v2707_v47  ;;  %v740_v52 = vmul.f32 %v2710_v41, %v2710_v41 }
 0x757   :  { %v2719_v50 = vadd.f32 %v710_v45, %v2631_v5  ;;  %v712_v59 = vpop.f32.mrb[9].mxu0 }
 0x758   :  { %v2722_v1 = vadd.f32 %v712_v59, %v2631_v5  ;;  %728 = vadd.xlane.f32.xlu0 %v727_v48  ;;  %v747_v2 = vadd.f32 %v740_v52, %v739_v43  ;;  %v2763_v48 = vld [vmem:[%s3139_s14] sm:$0xff]  ;;  %v1237_v52 = vpop.permute.xlu1 %1236 }
 0x759   :  { %v741_v3 = vmul.f32 %v2719_v50, %v2719_v50  ;;  %1958 = vmatprep.mubr.msk.f32.mxu0 %vm759_vm12, %v2763_v48 }
 0x75a   :  { %3154 = vst [vmem:[#allocation10_spill] sm:$0xff] %v2722_v1  ;;  %v716_v4 = vpop.f32.mrb[10].mxu0  ;;  %748 = vadd.xlane.f32.xlu1 %v747_v2  ;;  %v742_v8 = vmul.f32 %v2722_v1, %v2722_v1  ;;  %v730_v19 = vadd.f32 %v2722_v1, %v2719_v50  ;;  %v1239_v2 = vpop.permute.xlu0 %1238 }
 0x75b   :  { %v2729_v9 = vadd.f32 %v716_v4, %v2637_v44  ;;  %v718_v16 = vpop.f32.mrb[11].mxu0  ;;  %v1240_v47 = vsel %vm338_vm2, %v1237_v52, %v1239_v2 }
 0x75c   :  { %v2732_v10 = vadd.f32 %v718_v16, %v2637_v44  ;;  %v750_v12 = vadd.f32 %v742_v8, %v741_v3  ;;  %v1243_v59 = vpop.permute.xlu1 %1242 }
 0x75d   :  { %3155 = vst [vmem:[#allocation11_spill] sm:$0xff] %v2729_v9  ;;  %v743_v22 = vmul.f32 %v2729_v9, %v2729_v9 }
 0x75e   :  { %3156 = vst [vmem:[#allocation12_spill] sm:$0xff] %v2732_v10  ;;  %v722_v23 = vpop.f32.mrb[12].mxu0  ;;  %751 = vadd.xlane.f32.xlu0 %v750_v12  ;;  %731 = vadd.xlane.f32.xlu1 %v730_v19  ;;  %v744_v24 = vmul.f32 %v2732_v10, %v2732_v10  ;;  %v733_v55 = vadd.f32 %v2732_v10, %v2729_v9  ;;  %v1249_v4 = vpop.permute.xlu0 %1248 }
 0x75f   :  { %v724_v26 = vpop.f32.mrb[13].mxu0  ;;  %v2741_v28 = vadd.f32 %v722_v23, %v2644_v11 }
 0x760   :  { %v2744_v29 = vadd.f32 %v724_v26, %v2644_v11  ;;  %v753_v60 = vadd.f32 %v744_v24, %v743_v22  ;;  %v1245_v3 = vpop.permute.xlu1 %1244 }
 0x761   :  { %v745_v40 = vmul.f32 %v2741_v28, %v2741_v28  ;;  %v1246_v9 = vsel %vm345_vm3, %v1243_v59, %v1245_v3 }
 0x762   :  { %734 = vadd.xlane.f32.xlu0 %v733_v55  ;;  %754 = vadd.xlane.f32.xlu1 %v753_v60  ;;  %v736_v38 = vadd.f32 %v2744_v29, %v2741_v28  ;;  %v746_v43 = vmul.f32 %v2744_v29, %v2744_v29  ;;  %v1255_v16 = vpop.permute.xlu0 %1254 }
 0x764   :  { %v756_v45 = vadd.f32 %v746_v43, %v745_v40  ;;  %v1251_v8 = vpop.permute.xlu1 %1250 }
 0x766   :  { %737 = vadd.xlane.f32.xlu0 %v736_v38  ;;  %v1261_v19 = vpop.permute.xlu0 %1260 }
 0x768   :  { %v1257_v12 = vpop.permute.xlu1 %1256 }
 0x76a   :  { %757 = vadd.xlane.f32.xlu0 %v756_v45  ;;  %v2769_v23 = vpop.permute.xlu0 %1266 }
 0x76c   :  { %v1263_v22 = vpop.permute.xlu1 %1262 }
 0x770   :  { %v2771_v24 = vpop.permute.xlu1 %1268 }
 0x773   :  { %1274 = vrot.lane.b32.xlu1 %v2678_v39, %s2221_s20 }
 0x777   :  { %1280 = vrot.lane.b32.xlu1 %v2678_v39, %s2222_s21 }
 0x780   :  { %1272 = vrot.lane.b32.xlu0 %v2676_v37, %s2221_s20 }
 0x784   :  { %1278 = vrot.lane.b32.xlu0 %v2676_v37, %s2222_s21 }
 0x7e5   :  { %v729_v26 = vpop.xlane.xlu0 %728 }
 0x7e7   :  { %v749_v55 = vpop.xlane.xlu1 %748 }
 0x7eb   :  { %v752_v60 = vpop.xlane.xlu0 %751  ;;  %v732_v38 = vpop.xlane.xlu1 %731 }
 0x7ec   :  { %v2044_v40 = vpack.c.bf16 %v732_v38, %v729_v26  ;;  %v2052_v10 = vpack.c.bf16 %v752_v60, %v749_v55  ;;  %v1247_v26 = vsel %vm345_vm3, %v1245_v3, %v1243_v59  ;;  %v1287_v38 = vmul.f32 %v1246_v9, %v2435_v63 }
 0x7ed   :  { %v1258_v55 = vsel %vm359_vm5, %v1255_v16, %v1257_v12  ;;  %v1241_v60 = vsel %vm338_vm2, %v1239_v2, %v1237_v52  ;;  %v1259_v59 = vsel %vm359_vm5, %v1257_v12, %v1255_v16  ;;  %v1265_v9 = vsel %vm366_vm6, %v1263_v22, %v1261_v19 }
 0x7ee   :  { %2045 = vmatprep.subr.bf16.mxu0 %v2044_v40  ;;  %v1291_v63 = vmul.f32 %v1258_v55, %v2469_v21  ;;  %v1290_v52 = vmul.f32 %v1259_v59, %v2464_v20  ;;  %v1264_v2 = vsel %vm366_vm6, %v1261_v19, %v1263_v22  ;;  %v1295_v3 = vmul.f32 %v1265_v9, %v2493_v33  ;;  %v2821_v20 = vld [vmem:[%s3139_s14 + $0x18] sm:$0xff] }
 0x7ef   :  { %v735_v43 = vpop.xlane.xlu0 %734  ;;  %2047 = vmatpush3.bf16.msra.mxu0 %v2044_v40  ;;  %v755_v1 = vpop.xlane.xlu1 %754  ;;  %v1293_v33 = vmul.f32 %v2678_v39, %v2483_v31  ;;  %v1294_v19 = vmul.f32 %v1264_v2, %v2488_v32  ;;  %v1271_v22 = vsel %vm373_vm7, %v2771_v24, %v2769_v23  ;;  %v1292_v39 = vmul.f32 %v2676_v37, %v2498_v34  ;;  %v2847_v32 = vld [vmem:[%s3139_s14 + $0x28] sm:$0xff]  ;;  %v2857_v34 = vld [vmem:[%s3139_s14 + $0x30] sm:$0xff] }
 0x7f1   :  { %v2080_v31 = vpack.c.bf16 %v1295_v3, %v1293_v33  ;;  %v2082_v37 = vpack.c.bf16 %v1294_v19, %v1292_v39 }
 0x7f3   :  { %v738_v45 = vpop.xlane.xlu0 %737  ;;  %v1275_v16 = vpop.permute.xlu1 %1274 }
 0x7f4   :  { %v2048_v0 = vpack.c.bf16 %v738_v45, %v735_v43  ;;  %v1286_v43 = vmul.f32 %v1247_v26, %v2425_v61  ;;  %v1252_v45 = vsel %vm352_vm4, %v1249_v4, %v1251_v8  ;;  %v1253_v61 = vsel %vm352_vm4, %v1251_v8, %v1249_v4 }
 0x7f5   :  { %v1288_v4 = vmul.f32 %v1253_v61, %v2449_v14  ;;  %v2828_v14 = vld [vmem:[%s3139_s14 + $0x20] sm:$0xff] }
 0x7f6   :  { %2049 = vmatprep.subr.bf16.mxu0 %v2048_v0 }
 0x7f7   :  { %v758_v41 = vpop.xlane.xlu0 %757  ;;  %2051 = vmatpush3.bf16.msra.mxu0 %v2048_v0  ;;  %v1285_v0 = vmul.f32 %v1240_v47, %v2430_v62  ;;  %v2797_v62 = vld [vmem:[%s3139_s14 + $0x8] sm:$0xff]  ;;  %v1289_v47 = vmul.f32 %v1252_v45, %v2455_v17  ;;  %v2078_v12 = vpack.c.bf16 %v1290_v52, %v1288_v4 }
 0x7f8   :  { %2053 = vmatprep.subr.bf16.mxu0 %v2052_v10  ;;  %v2056_v40 = vpack.c.bf16 %v758_v41, %v755_v1  ;;  %v1284_v1 = vmul.f32 %v1241_v60, %v2415_v58  ;;  %v2805_v58 = vld [vmem:[%s3139_s14 + $0x10] sm:$0xff] }
 0x7f9   :  { %v2072_v41 = vpack.c.bf16 %v1287_v38, %v1285_v0  ;;  %v2076_v17 = vpack.c.bf16 %v1291_v63, %v1289_v47  ;;  %v1281_v0 = vpop.permute.xlu1 %1280 }
 0x7fa   :  { %v2074_v21 = vpack.c.bf16 %v1286_v43, %v1284_v1 }
 0x7fb   :  { %2055 = vmatpush3.bf16.msra.mxu0 %v2052_v10  ;;  %v1273_v10 = vpop.permute.xlu0 %1272 }
 0x7fc   :  { %2057 = vmatprep.subr.bf16.mxu0 %v2056_v40  ;;  %v1277_v8 = vsel %vm380_vm8, %v1275_v16, %v1273_v10  ;;  %v1276_v26 = vsel %vm380_vm8, %v1273_v10, %v1275_v16 }
 0x7fd   :  { %v1299_v38 = vmul.f32 %v1277_v8, %v2534_v57  ;;  %v1270_v57 = vsel %vm373_vm7, %v2769_v23, %v2771_v24  ;;  %v1298_v60 = vmul.f32 %v1276_v26, %v2529_v56  ;;  %v2870_v23 = vld [vmem:[%s3139_s14 + $0x38] sm:$0xff] }
 0x7fe   :  { %v1296_v45 = vmul.f32 %v1270_v57, %v2514_v53  ;;  %v3157_v53 = vmov 0.0  }
 0x7ff   :  { %2059 = vmatpush3.bf16.msra.mxu0 %v2056_v40  ;;  %v1297_v40 = vmul.f32 %v1271_v22, %v2520_v51  ;;  %v1279_v55 = vpop.permute.xlu0 %1278 }
 0x800   :  { %2073 = vmatprep.subr.bf16.mxu0 %v2072_v41  ;;  %v1283_v51 = vsel %vm387_vm9, %v1281_v0, %v1279_v55  ;;  %v2086_v56 = vpack.c.bf16 %v1298_v60, %v1296_v45  ;;  %v1282_v24 = vsel %vm387_vm9, %v1279_v55, %v1281_v0 }
 0x801   :  { %v2084_v43 = vpack.c.bf16 %v1299_v38, %v1297_v40  ;;  %v1301_v59 = vmul.f32 %v1283_v51, %v2548_v6  ;;  %v1300_v63 = vmul.f32 %v1282_v24, %v2555_v18 }
 0x802   :  { %1959 = vmatmul.mubr.msk.f32.vlgmr.msra.gmra.mrb[14].mxu0 %vm759_vm12, %v2797_v62 }
 0x803   :  { %2075 = vmatpush1.bf16.msra.mxu0 %v2074_v21  ;;  %1961 = vmatprep.mubr.msk.f32.mxu0 %vm759_vm12, %v2805_v58 }
 0x804   :  { %2077 = vmatprep.subr.bf16.mxu0 %v2076_v17 }
 0x806   :  { %1962 = vmatmul.mubr.msk.f32.gmra.mrb[16].mxu0 %vm759_vm12, %v2821_v20 }
 0x807   :  { %2079 = vmatpush1.bf16.msra.mxu0 %v2078_v12  ;;  %1964 = vmatprep.mubr.msk.f32.mxu0 %vm759_vm12, %v2828_v14 }
 0x808   :  { %2081 = vmatprep.subr.bf16.mxu0 %v2080_v31 }
 0x80a   :  { %1965 = vmatmul.mubr.msk.f32.gmra.mrb[18].mxu0 %vm759_vm12, %v2847_v32 }
 0x80b   :  { %2083 = vmatpush1.bf16.msra.mxu0 %v2082_v37  ;;  %1967 = vmatprep.mubr.msk.f32.mxu0 %vm759_vm12, %v2857_v34 }
 0x80c   :  { %2085 = vmatprep.subr.bf16.mxu0 %v2084_v43 }
 0x80e   :  { %1968 = vmatmul.mubr.msk.f32.gmra.mrb[20].mxu0 %vm759_vm12, %v2870_v23 }
 0x80f   :  { %2087 = vmatpush1.bf16.msra.mxu0 %v2086_v56  ;;  %1366 = vmatprep.mubr.f32.mxu0 %v3157_v53 }
 0x810   :  { %1318 = vmatprep.subr.mxu0 %v1301_v59 }
 0x813   :  { %1319 = vmatpush1.msra.mxu0 %v1300_v63 }
 0x814   :  { %1865 = vmatmul.mubr.msk.f32.vlgmr.msra.gmra.mrb[22].mxu0 %vm413_vm10, %v2564_v35 }
 0x815   :  { %1981 = vmatprep.mubr.msk.f32.mxu0 %vm216_vm1, %v2343_v25 }
 0x8d5   :  { %v2883_v54 = vpop.f32.mrb[14].mxu0 }
 0x8d6   :  { %v2885_v41 = vpop.f32.mrb[15].mxu0  ;;  %v2893_v9 = vmul.f32 %v2883_v54, %v2883_v54 }
 0x8d7   :  { %v2897_v18 = vmul.f32 %v2885_v41, %v2885_v41 }
 0x8d9   :  { %v2887_v6 = vpop.f32.mrb[16].mxu0 }
 0x8da   :  { %v2889_v1 = vpop.f32.mrb[17].mxu0  ;;  %v2909_v10 = vmul.f32 %v2887_v6, %v2887_v6 }
 0x8db   :  { %v2913_v21 = vmul.f32 %v2889_v1, %v2889_v1 }
 0x8dd   :  { %v2899_v35 = vpop.f32.mrb[18].mxu0 }
 0x8de   :  { %v894_v25 = vsub.f32 %v2899_v35, %v2893_v9  ;;  %v2903_v61 = vpop.f32.mrb[19].mxu0 }
 0x8df   :  { %v893_v47 = vsub.f32 %v2903_v61, %v2897_v18  ;;  %v84_v61 = vld [vmem:[%s3137_s12] sm:$0xff] }
 0x8e1   :  { %v2915_v52 = vpop.f32.mrb[20].mxu0 }
 0x8e2   :  { %v896_v2 = vsub.f32 %v2915_v52, %v2909_v10  ;;  %v2919_v3 = vpop.f32.mrb[21].mxu0  ;;  %v88_v10 = vld [vmem:[%s3138_s13] sm:$0xff] }
 0x8e3   :  { %v895_v16 = vsub.f32 %v2919_v3, %v2913_v21  ;;  %v90_v21 = vld [vmem:[%s3138_s13 + $0x10] sm:$0xff] }
 0x8e5   :  { %v899_v9 = vadd.f32 1e-05, %v895_v16 }
 0x8e7   :  { %v1368_v17 = vpop.f32.mrb[22].mxu0 }
 0x8e8   :  { %v1369_v4 = vadd.f32 %v1368_v17, %v2573_v42  ;;  %v1370_v8 = vpop.f32.mrb[23].mxu0 }
 0x8e9   :  { %v1371_v33 = vadd.f32 %v1370_v8, %v2573_v42 }
 0x8ea   :  { %v1376_v12 = vmul.f32 %v1369_v4, %v1369_v4 }
 0x8eb   :  { %v1373_v19 = vadd.f32 %v1371_v33, %v1369_v4  ;;  %v1377_v22 = vmul.f32 %v1371_v33, %v1371_v33 }
 0x8ed   :  { %1374 = vadd.xlane.f32.xlu0 %v1373_v19  ;;  %v1378_v26 = vadd.f32 %v1377_v22, %v1376_v12 }
 0x8ef   :  { %1379 = vadd.xlane.f32.xlu1 %v1378_v26 }
 0x97a   :  { %v1375_v38 = vpop.xlane.xlu0 %1374 }
 0x97c   :  { %v1380_v31 = vpop.xlane.xlu1 %1379 }
 0x97d   :  { %v2088_v39 = vpack.c.bf16 %v1380_v31, %v1375_v38 }
 0x97f   :  { %2089 = vmatprep.subr.bf16.mxu0 %v2088_v39 }
 0x980   :  { %2091 = vmatpush3.bf16.msra.mxu0 %v2088_v39 }
 0x983   :  { %1982 = vmatmul.mubr.msk.f32.vlgmr.msra.gmra.mrb[24].mxu0 %vm216_vm1, %v2353_v30 }
 0xa56   :  { %v1983_v57 = vpop.f32.mrb[24].mxu0 }
 0xa57   :  { %v1447_v40 = vpop.f32.mrb[25].mxu0 }
 0xa58   :  { %v1456_v55 = vmul.f32 %v1447_v40, %v1447_v40  ;;  %1462 = vperm.xlu0 %2121, %v1447_v40  }
 0xa5a   :  { %v1457_v37 = vsub.f32 %v1983_v57, %v1456_v55 }
 0xa5c   :  { %v1458_v42 = vadd.f32 1e-05, %v1457_v37 }
 0xa5e   :  { %2129 = vrsqrt.f32 %v1458_v42 }
 0xa68   :  { %v2130_v60 = vpop.eup %2129 }
 0xa69   :  { %1469 = vperm.xlu1 %2122, %v2130_v60  }
 0xad7   :  { %v1463_v0 = vpop.permute.xlu0 %1462 }
 0xad8   :  { %v1465_v43 = vsub.f32 %v1369_v4, %v1463_v0  ;;  %v1466_v45 = vsub.f32 %v1371_v33, %v1463_v0 }
 0xae8   :  { %v1470_v51 = vpop.permute.xlu1 %1469 }
 0xae9   :  { %v1472_v56 = vmul.f32 %v1470_v51, %v1465_v43  ;;  %v1473_v24 = vmul.f32 %v1470_v51, %v1466_v45 }
 0xaeb   :  { %v1474_v59 = vmul.f32 %v1472_v56, %v2623_v49  ;;  %v1475_v63 = vmul.f32 %v1473_v24, %v2623_v49 }
 0xaed   :  { %v1476_v30 = vadd.f32 %v1474_v59, %v2625_v15  ;;  %v1477_v17 = vadd.f32 %v1475_v63, %v2625_v15  ;;  %v898_v59 = vadd.f32 1e-05, %v894_v25  ;;  %v900_v63 = vadd.f32 1e-05, %v896_v2 }
 0xaef   :  { %v1478_v8 = vmax.f32 %v1476_v30, 0.0  ;;  %v1479_v12 = vmax.f32 %v1477_v17, 0.0  ;;  %2131 = vrsqrt.f32 %v898_v59  ;;  %v897_v30 = vadd.f32 1e-05, %v893_v47  ;;  %v86_v47 = vld [vmem:[%s3137_s12 + $0x10] sm:$0xff] }
 0xaf0   :  { %2133 = vrsqrt.f32 %v900_v63 }
 0xaf1   :  { %1480 = vmatprep.subr.mxu1 %v1479_v12  ;;  %2135 = vrsqrt.f32 %v897_v30 }
 0xaf2   :  { %1481 = vmatpush1.msra.mxu1 %v1478_v8  ;;  %2137 = vrsqrt.f32 %v899_v9  ;;  %v3161_v9 = vld [vmem:[#allocation11_spill] sm:$0xff] }
 0xaf3   :  { %1868 = vmatmul.mubr.msk.f32.vlgmr.msra.gmra.mrb[6].mxu1 %vm625_vm11, %v2642_v46 }
 0xaf4   :  { %1550 = vmatprep.mubr.f32.mxu1 %v3157_v53 }
 0xaf7   :  { %1869 = vmatmul.mubr.msk.f32.gmra.mrb[8].mxu1 %vm625_vm11, %v2652_v13 }
 0xaf8   :  { %1556 = vmatprep.mubr.f32.mxu1 %v3157_v53 }
 0xafb   :  { %1870 = vmatmul.mubr.msk.f32.gmra.mrb[10].mxu1 %vm625_vm11, %v2662_v27 }
 0xafc   :  { %1562 = vmatprep.mubr.f32.mxu1 %v3157_v53 }
 0xaff   :  { %1871 = vmatmul.mubr.msk.f32.gmra.mrb[12].mxu1 %vm625_vm11, %v2674_v36 }
 0xb00   :  { %2000 = vmatprep.mubr.msk.f32.mxu1 %vm759_vm12, %v2763_v48 }
 0xbc6   :  { %v1546_v49 = vpop.f32.mrb[6].mxu1 }
 0xbc7   :  { %v2945_v15 = vadd.f32 %v1546_v49, %v2633_v7  ;;  %v1548_v46 = vpop.f32.mrb[7].mxu1 }
 0xbc8   :  { %v2948_v13 = vadd.f32 %v1548_v46, %v2633_v7 }
 0xbc9   :  { %v1581_v7 = vmul.f32 %v2945_v15, %v2945_v15 }
 0xbca   :  { %v1552_v4 = vpop.f32.mrb[8].mxu1  ;;  %v1569_v27 = vadd.f32 %v2948_v13, %v2945_v15  ;;  %v1582_v22 = vmul.f32 %v2948_v13, %v2948_v13 }
 0xbcb   :  { %v2953_v53 = vadd.f32 %v1552_v4, %v2631_v5  ;;  %v1554_v33 = vpop.f32.mrb[9].mxu1 }
 0xbcc   :  { %v2956_v36 = vadd.f32 %v1554_v33, %v2631_v5  ;;  %1570 = vadd.xlane.f32.xlu0 %v1569_v27  ;;  %v1589_v39 = vadd.f32 %v1582_v22, %v1581_v7 }
 0xbcd   :  { %v1583_v43 = vmul.f32 %v2953_v53, %v2953_v53 }
 0xbce   :  { %v1558_v48 = vpop.f32.mrb[10].mxu1  ;;  %v1572_v19 = vadd.f32 %v2956_v36, %v2953_v53  ;;  %v1584_v45 = vmul.f32 %v2956_v36, %v2956_v36 }
 0xbcf   :  { %v2965_v26 = vadd.f32 %v1558_v48, %v2637_v44  ;;  %v1560_v38 = vpop.f32.mrb[11].mxu1 }
 0xbd0   :  { %v2968_v31 = vadd.f32 %v1560_v38, %v2637_v44  ;;  %1573 = vadd.xlane.f32.xlu1 %v1572_v19  ;;  %v1592_v51 = vadd.f32 %v1584_v45, %v1583_v43 }
 0xbd1   :  { %v1585_v40 = vmul.f32 %v2965_v26, %v2965_v26 }
 0xbd2   :  { %v1564_v5 = vpop.f32.mrb[12].mxu1  ;;  %v1575_v57 = vadd.f32 %v2968_v31, %v2965_v26  ;;  %v1586_v55 = vmul.f32 %v2968_v31, %v2968_v31 }
 0xbd3   :  { %v2977_v37 = vadd.f32 %v1564_v5, %v2644_v11  ;;  %v1566_v42 = vpop.f32.mrb[13].mxu1 }
 0xbd4   :  { %v2980_v60 = vadd.f32 %v1566_v42, %v2644_v11  ;;  %1590 = vadd.xlane.f32.xlu1 %v1589_v39  ;;  %1576 = vadd.xlane.f32.xlu0 %v1575_v57  ;;  %v1595_v44 = vadd.f32 %v1586_v55, %v1585_v40 }
 0xbd5   :  { %v1587_v56 = vmul.f32 %v2977_v37, %v2977_v37 }
 0xbd6   :  { %v1578_v0 = vadd.f32 %v2980_v60, %v2977_v37  ;;  %v1588_v11 = vmul.f32 %v2980_v60, %v2980_v60 }
 0xbd8   :  { %1596 = vadd.xlane.f32.xlu1 %v1595_v44  ;;  %1579 = vadd.xlane.f32.xlu0 %v1578_v0  ;;  %v1598_v24 = vadd.f32 %v1588_v11, %v1587_v56 }
 0xbdc   :  { %1593 = vadd.xlane.f32.xlu0 %v1592_v51  ;;  %v3160_v51 = vld [vmem:[#allocation9_spill] sm:$0xff] }
 0xbe0   :  { %1599 = vadd.xlane.f32.xlu0 %v1598_v24 }
 0xbe9   :  { %907 = vperm.xlu1 %2122, %v2885_v41   ;;  %v2132_v41 = vpop.eup %2131 }
 0xbea   :  { %v2134_v35 = vpop.eup %2133 }
 0xbeb   :  { %v2136_v25 = vpop.eup %2135 }
 0xbec   :  { %v2138_v18 = vpop.eup %2137 }
 0xbed   :  { %917 = vperm.xlu1 %2122, %v2889_v1   ;;  %v85_v1 = vld [vmem:[%s3137_s12 + $0x8] sm:$0xff] }
 0xbf1   :  { %922 = vperm.xlu1 %2122, %v2887_v6   ;;  %v87_v6 = vld [vmem:[%s3137_s12 + $0x18] sm:$0xff] }
 0xbf5   :  { %940 = vperm.xlu1 %2122, %v2132_v41  }
 0xbf6   :  { %912 = vperm.xlu0 %2121, %v2883_v54   ;;  %v89_v54 = vld [vmem:[%s3138_s13 + $0x8] sm:$0xff] }
 0xbf9   :  { %950 = vperm.xlu1 %2122, %v2134_v35   ;;  %v3162_v35 = vld [vmem:[#allocation12_spill] sm:$0xff] }
 0xbfa   :  { %935 = vperm.xlu0 %2121, %v2136_v25  }
 0xbfd   :  { %968 = vperm.xlu1 %2122, %v85_v1  }
 0xbfe   :  { %945 = vperm.xlu0 %2121, %v2138_v18  }
 0xc01   :  { %978 = vperm.xlu1 %2122, %v87_v6  }
 0xc02   :  { %963 = vperm.xlu0 %2121, %v84_v61  }
 0xc05   :  { %996 = vperm.xlu1 %2122, %v89_v54  }
 0xc06   :  { %973 = vperm.xlu0 %2121, %v86_v47  }
 0xc0a   :  { %991 = vperm.xlu0 %2121, %v88_v10  }
 0xc0e   :  { %1001 = vperm.xlu0 %2121, %v90_v21   ;;  %v2147_v21 = vld [vmem:[#allocation2 + $0x10] sm:$0xff] }
 0xc59   :  { %v1571_v52 = vpop.xlane.xlu0 %1570 }
 0xc5d   :  { %v1574_v2 = vpop.xlane.xlu1 %1573 }
 0xc5e   :  { %v2092_v3 = vpack.c.bf16 %v1574_v2, %v1571_v52  ;;  %v2148_v2 = vld [vmem:[#allocation2 + $0x18] sm:$0xff] }
 0xc60   :  { %2093 = vmatprep.subr.bf16.mxu1 %v2092_v3 }
 0xc61   :  { %v1591_v16 = vpop.xlane.xlu1 %1590  ;;  %2095 = vmatpush3.bf16.msra.mxu1 %v2092_v3  ;;  %v1577_v17 = vpop.xlane.xlu0 %1576 }
 0xc65   :  { %v1597_v8 = vpop.xlane.xlu1 %1596  ;;  %v1580_v12 = vpop.xlane.xlu0 %1579 }
 0xc66   :  { %v2096_v49 = vpack.c.bf16 %v1580_v12, %v1577_v17 }
 0xc68   :  { %2097 = vmatprep.subr.bf16.mxu1 %v2096_v49 }
 0xc69   :  { %v908_v46 = vpop.permute.xlu1 %907  ;;  %2099 = vmatpush3.bf16.msra.mxu1 %v2096_v49  ;;  %v1594_v4 = vpop.xlane.xlu0 %1593 }
 0xc6a   :  { %v2100_v27 = vpack.c.bf16 %v1594_v4, %v1591_v16  ;;  %v926_v56 = vsub.f32 %v3160_v51, %v908_v46 }
 0xc6c   :  { %2101 = vmatprep.subr.bf16.mxu1 %v2100_v27 }
 0xc6d   :  { %v918_v33 = vpop.permute.xlu1 %917  ;;  %2103 = vmatpush3.bf16.msra.mxu1 %v2100_v27  ;;  %v1600_v48 = vpop.xlane.xlu0 %1599 }
 0xc6e   :  { %v2104_v19 = vpack.c.bf16 %v1600_v48, %v1597_v8  ;;  %v929_v41 = vsub.f32 %v3161_v9, %v918_v33  ;;  %v930_v25 = vsub.f32 %v3162_v35, %v918_v33  ;;  %v2149_v48 = vld [vmem:[#allocation2] sm:$0xff] }
 0xc70   :  { %2105 = vmatprep.subr.bf16.mxu1 %v2104_v19 }
 0xc71   :  { %v923_v7 = vpop.permute.xlu1 %922  ;;  %2107 = vmatpush3.bf16.msra.mxu1 %v2104_v19 }
 0xc72   :  { %v931_v5 = vsub.f32 %v2741_v28, %v923_v7  ;;  %v932_v39 = vsub.f32 %v2744_v29, %v923_v7  ;;  %v2150_v7 = vld [vmem:[#allocation2 + $0x8] sm:$0xff] }
 0xc74   :  { %2001 = vmatmul.mubr.msk.f32.vlgmr.msra.gmra.mrb[14].mxu1 %vm759_vm12, %v2797_v62 }
 0xc75   :  { %v941_v22 = vpop.permute.xlu1 %940  ;;  %v913_v38 = vpop.permute.xlu0 %912  ;;  %2003 = vmatprep.mubr.msk.f32.mxu1 %vm759_vm12, %v2805_v58 }
 0xc76   :  { %v927_v29 = vsub.f32 %v2719_v50, %v913_v38 }
 0xc78   :  { %2004 = vmatmul.mubr.msk.f32.gmra.mrb[16].mxu1 %vm759_vm12, %v2821_v20  ;;  %v3158_v20 = vld [vmem:[#allocation10_spill] sm:$0xff]  ;;  %v955_v0 = vmul.f32 %v941_v22, %v927_v29  ;;  %v2151_v29 = vld [vmem:[#allocation2 + $0x20] sm:$0xff] }
 0xc79   :  { %v951_v57 = vpop.permute.xlu1 %950  ;;  %v936_v40 = vpop.permute.xlu0 %935  ;;  %2006 = vmatprep.mubr.msk.f32.mxu1 %vm759_vm12, %v2828_v14  ;;  %v928_v42 = vsub.f32 %v3158_v20, %v913_v38 }
 0xc7a   :  { %v3039_v55 = vmul.f32 %v951_v57, %v931_v5  ;;  %v3041_v62 = vmul.f32 %v951_v57, %v932_v39 }
 0xc7b   :  { %v956_v43 = vmul.f32 %v941_v22, %v928_v42  ;;  %v2152_v42 = vld [vmem:[#allocation2 + $0x28] sm:$0xff] }
 0xc7c   :  { %2007 = vmatmul.mubr.msk.f32.gmra.mrb[18].mxu1 %vm759_vm12, %v2847_v32  ;;  %v3159_v32 = vld [vmem:[#allocation8_spill] sm:$0xff] }
 0xc7d   :  { %v3045_v58 = vpop.permute.xlu1 %968  ;;  %v946_v28 = vpop.permute.xlu0 %945  ;;  %2009 = vmatprep.mubr.msk.f32.mxu1 %vm759_vm12, %v2857_v34  ;;  %v925_v45 = vsub.f32 %v3159_v32, %v908_v46 }
 0xc7e   :  { %v983_v11 = vmul.f32 %v3045_v58, %v955_v0  ;;  %v984_v34 = vmul.f32 %v3045_v58, %v956_v43  ;;  %v957_v54 = vmul.f32 %v946_v28, %v929_v41  ;;  %v958_v47 = vmul.f32 %v946_v28, %v930_v25 }
 0xc7f   :  { %v953_v59 = vmul.f32 %v936_v40, %v925_v45 }
 0xc80   :  { %2010 = vmatmul.mubr.msk.f32.gmra.mrb[20].mxu1 %vm759_vm12, %v2870_v23  ;;  %v954_v23 = vmul.f32 %v936_v40, %v926_v56 }
 0xc81   :  { %v3053_v14 = vpop.permute.xlu1 %978  ;;  %v3055_v44 = vpop.permute.xlu0 %963 }
 0xc82   :  { %v981_v1 = vmul.f32 %v3055_v44, %v953_v59  ;;  %v982_v18 = vmul.f32 %v3055_v44, %v954_v23 }
 0xc85   :  { %v3061_v50 = vpop.permute.xlu1 %996  ;;  %v3063_v24 = vpop.permute.xlu0 %973 }
 0xc86   :  { %v1011_v63 = vadd.f32 %v3061_v50, %v983_v11  ;;  %v1012_v30 = vadd.f32 %v3061_v50, %v984_v34  ;;  %v985_v8 = vmul.f32 %v3063_v24, %v957_v54  ;;  %v986_v12 = vmul.f32 %v3063_v24, %v958_v47 }
 0xc88   :  { %v1019_v6 = vmax.f32 %v1011_v63, 0.0  ;;  %v1020_v61 = vmax.f32 %v1012_v30, 0.0 }
 0xc89   :  { %v3071_v10 = vpop.permute.xlu0 %991 }
 0xc8a   :  { %v1027_v52 = vadd.f32 %v2147_v21, %v1019_v6  ;;  %v1028_v3 = vadd.f32 %v2148_v2, %v1020_v61  ;;  %v1009_v16 = vadd.f32 %v3071_v10, %v981_v1  ;;  %v1010_v17 = vadd.f32 %v3071_v10, %v982_v18 }
 0xc8c   :  { %v1035_v49 = vmax.f32 %v1027_v52, 0.0  ;;  %v1036_v46 = vmax.f32 %v1028_v3, 0.0  ;;  %v1017_v4 = vmax.f32 %v1009_v16, 0.0  ;;  %v1018_v27 = vmax.f32 %v1010_v17, 0.0  ;;  %v91_v17 = vld [vmem:[%s3138_s13 + $0x18] sm:$0xff]  ;;  %s2223_s13 = smov [#allocation5]  }
 0xc8d   :  { %v3077_v33 = vpop.permute.xlu0 %1001  ;;  %s1832_s19 = sshll.u32 %s2223_s13, 4  ;;  %s1833_s19 = int_to_ptr.vmem [resolvable:$true] %s1832_s19 }
 0xc8e   :  { %1043 = vst [vmem:[#allocation5 + $0x10] sm:$0xff] %v1035_v49  ;;  %1044 = vst [vmem:[#allocation5 + $0x18] sm:$0xff] %v1036_v46  ;;  %v1025_v19 = vadd.f32 %v2149_v48, %v1017_v4  ;;  %v1026_v22 = vadd.f32 %v2150_v7, %v1018_v27  ;;  %v1013_v38 = vadd.f32 %v3077_v33, %v985_v8  ;;  %s2185_s20 = scalar_lea.vmem %s1833_s19, 2048  ;;  %p2190_p9 = scmp.lt.s32.totalorder %s1833_s19, %s1833_s19 }
 0xc8f   :  { %v1014_v5 = vadd.f32 %v3077_v33, %v986_v12  ;;  %p2186_p8 = scmp.ne.s32.totalorder %s1833_s19, %s2185_s20  ;;  %p2191_p10 = scmp.lt.s32.totalorder %s2185_s20, %s2185_s20 }
 0xc90   :  { %v1033_v39 = vmax.f32 %v1025_v19, 0.0  ;;  %v1034_v57 = vmax.f32 %v1026_v22, 0.0  ;;  %v1021_v40 = vmax.f32 %v1013_v38, 0.0 }
 0xc91   :  { %v1022_v28 = vmax.f32 %v1014_v5, 0.0  ;;  %p2192_p11 = por %p2191_p10, %p2190_p9 }
 0xc92   :  { %1041 = vst [vmem:[#allocation5] sm:$0xff] %v1033_v39  ;;  %1042 = vst [vmem:[#allocation5 + $0x8] sm:$0xff] %v1034_v57  ;;  %v1029_v20 = vadd.f32 %v2151_v29, %v1021_v40 }
 0xc93   :  { %v1030_v0 = vadd.f32 %v2152_v42, %v1022_v28  ;;  %p2193_p12 = pnand %p2192_p11, %p2186_p8 }
 0xc94   :  { %v1037_v43 = vmax.f32 %v1029_v20, 0.0 }
 0xc95   :  { %v1038_v32 = vmax.f32 %v1030_v0, 0.0 }
 0xc96   :  { %1045 = vst [vmem:[#allocation5 + $0x20] sm:$0xff] %v1037_v43 }
 0xc97   :  { %1046 = vst [vmem:[#allocation5 + $0x28] sm:$0xff] %v1038_v32 }
 0xd47   :  { %v2002_v45 = vpop.f32.mrb[14].mxu1 }
 0xd48   :  { %1729 = vperm.xlu0 %2121, %v2002_v45   ;;  %v1667_v51 = vpop.f32.mrb[15].mxu1  ;;  %v1707_v34 = vmul.f32 %v2002_v45, %v2002_v45 }
 0xd49   :  { %1724 = vperm.xlu1 %2122, %v1667_v51   ;;  %v1706_v59 = vmul.f32 %v1667_v51, %v1667_v51 }
 0xd4b   :  { %v2005_v56 = vpop.f32.mrb[16].mxu1 }
 0xd4c   :  { %1739 = vperm.xlu0 %2121, %v2005_v56   ;;  %v1677_v11 = vpop.f32.mrb[17].mxu1  ;;  %v1709_v41 = vmul.f32 %v2005_v56, %v2005_v56 }
 0xd4d   :  { %1734 = vperm.xlu1 %2122, %v1677_v11   ;;  %v1708_v25 = vmul.f32 %v1677_v11, %v1677_v11  ;;  %v987_v11 = vmul.f32 %v3053_v14, %v3039_v55 }
 0xd4f   :  { %v2008_v23 = vpop.f32.mrb[18].mxu1 }
 0xd50   :  { %v1711_v63 = vsub.f32 %v2008_v23, %v1707_v34  ;;  %v1687_v30 = vpop.f32.mrb[19].mxu1 }
 0xd51   :  { %v1710_v9 = vsub.f32 %v1687_v30, %v1706_v59 }
 0xd52   :  { %v1715_v35 = vadd.f32 1e-05, %v1711_v63  ;;  %v2153_v63 = vld [vmem:[#allocation2 + $0x50] sm:$0xff] }
 0xd53   :  { %v1714_v1 = vadd.f32 1e-05, %v1710_v9  ;;  %v2011_v18 = vpop.f32.mrb[20].mxu1  ;;  %v2154_v9 = vld [vmem:[#allocation2 + $0x58] sm:$0xff] }
 0xd54   :  { %2139 = vrsqrt.f32 %v1715_v35  ;;  %v1713_v6 = vsub.f32 %v2011_v18, %v1709_v41  ;;  %v1697_v61 = vpop.f32.mrb[21].mxu1  ;;  %v2156_v18 = vld [vmem:[#allocation2 + $0x48] sm:$0xff] }
 0xd55   :  { %2141 = vrsqrt.f32 %v1714_v1  ;;  %v1712_v54 = vsub.f32 %v1697_v61, %v1708_v25  ;;  %v2155_v1 = vld [vmem:[#allocation2 + $0x40] sm:$0xff] }
 0xd56   :  { %v1717_v47 = vadd.f32 1e-05, %v1713_v6 }
 0xd57   :  { %v1716_v21 = vadd.f32 1e-05, %v1712_v54 }
 0xd58   :  { %2143 = vrsqrt.f32 %v1717_v47 }
 0xd59   :  { %2145 = vrsqrt.f32 %v1716_v21 }
 0xd5e   :  { %v2140_v52 = vpop.eup %2139 }
 0xd5f   :  { %v2142_v2 = vpop.eup %2141  ;;  %1757 = vperm.xlu0 %2121, %v2140_v52  }
 0xd60   :  { %1752 = vperm.xlu1 %2122, %v2142_v2  }
 0xd62   :  { %v2144_v3 = vpop.eup %2143 }
 0xd63   :  { %v2146_v16 = vpop.eup %2145  ;;  %1767 = vperm.xlu0 %2121, %v2144_v3  }
 0xd64   :  { %1762 = vperm.xlu1 %2122, %v2146_v16  }
 0xd68   :  { %1006 = vperm.xlu1 %2122, %v91_v17  }
 0xdc7   :  { %v1730_v8 = vpop.permute.xlu0 %1729 }
 0xdc8   :  { %v1725_v12 = vpop.permute.xlu1 %1724  ;;  %v1744_v4 = vsub.f32 %v2953_v53, %v1730_v8  ;;  %v1745_v27 = vsub.f32 %v2956_v36, %v1730_v8 }
 0xdc9   :  { %v1742_v48 = vsub.f32 %v2945_v15, %v1725_v12  ;;  %v1743_v19 = vsub.f32 %v2948_v13, %v1725_v12 }
 0xdcb   :  { %v1740_v49 = vpop.permute.xlu0 %1739 }
 0xdcc   :  { %v1735_v46 = vpop.permute.xlu1 %1734  ;;  %v1748_v40 = vsub.f32 %v2977_v37, %v1740_v49  ;;  %v1749_v28 = vsub.f32 %v2980_v60, %v1740_v49  ;;  %v2157_v49 = vld [vmem:[#allocation2 + $0x60] sm:$0xff] }
 0xdcd   :  { %v1746_v36 = vsub.f32 %v2965_v26, %v1735_v46  ;;  %v1747_v15 = vsub.f32 %v2968_v31, %v1735_v46 }
 0xdde   :  { %v1758_v7 = vpop.permute.xlu0 %1757 }
 0xddf   :  { %v1772_v22 = vmul.f32 %v1758_v7, %v1744_v4  ;;  %v1773_v38 = vmul.f32 %v1758_v7, %v1745_v27  ;;  %v1753_v5 = vpop.permute.xlu1 %1752  ;;  %v2158_v4 = vld [vmem:[#allocation2 + $0x68] sm:$0xff]  ;;  %v2159_v27 = vld [vmem:[#allocation2 + $0x30] sm:$0xff] }
 0xde0   :  { %v1770_v39 = vmul.f32 %v1753_v5, %v1742_v48  ;;  %v1771_v57 = vmul.f32 %v1753_v5, %v1743_v19  ;;  %v2160_v19 = vld [vmem:[#allocation2 + $0x38] sm:$0xff] }
 0xde1   :  { %v1780_v29 = vmul.f32 %v1772_v22, %v3045_v58  ;;  %v1781_v53 = vmul.f32 %v1773_v38, %v3045_v58 }
 0xde2   :  { %v1778_v13 = vmul.f32 %v1770_v39, %v3055_v44  ;;  %v1779_v20 = vmul.f32 %v1771_v57, %v3055_v44  ;;  %v1768_v42 = vpop.permute.xlu0 %1767  ;;  %v988_v44 = vmul.f32 %v3053_v14, %v3041_v62 }
 0xde3   :  { %v1788_v0 = vadd.f32 %v1780_v29, %v3061_v50  ;;  %v1789_v43 = vadd.f32 %v1781_v53, %v3061_v50  ;;  %v1776_v37 = vmul.f32 %v1768_v42, %v1748_v40  ;;  %v1777_v32 = vmul.f32 %v1768_v42, %v1749_v28  ;;  %v1763_v60 = vpop.permute.xlu1 %1762  ;;  %v2161_v28 = vld [vmem:[#allocation2 + $0x70] sm:$0xff]  ;;  %v2162_v53 = vld [vmem:[#allocation2 + $0x78] sm:$0xff] }
 0xde4   :  { %v1786_v45 = vadd.f32 %v1778_v13, %v3071_v10  ;;  %v1787_v58 = vadd.f32 %v1779_v20, %v3071_v10  ;;  %v1774_v51 = vmul.f32 %v1763_v60, %v1746_v36  ;;  %v1775_v26 = vmul.f32 %v1763_v60, %v1747_v15 }
 0xde5   :  { %v1796_v56 = vmax.f32 %v1788_v0, 0.0  ;;  %v1797_v31 = vmax.f32 %v1789_v43, 0.0  ;;  %v1784_v41 = vmul.f32 %v1776_v37, %v3053_v14  ;;  %v1785_v35 = vmul.f32 %v1777_v32, %v3053_v14 }
 0xde6   :  { %v1794_v34 = vmax.f32 %v1786_v45, 0.0  ;;  %v1795_v59 = vmax.f32 %v1787_v58, 0.0  ;;  %v1782_v50 = vmul.f32 %v1774_v51, %v3063_v24  ;;  %v1783_v23 = vmul.f32 %v1775_v26, %v3063_v24 }
 0xde7   :  { %v1804_v30 = vadd.f32 %v2153_v63, %v1796_v56  ;;  %v1805_v10 = vadd.f32 %v2154_v9, %v1797_v31  ;;  %v1007_v25 = vpop.permute.xlu1 %1006 }
 0xde8   :  { %v1802_v55 = vadd.f32 %v2155_v1, %v1794_v34  ;;  %v1803_v6 = vadd.f32 %v2156_v18, %v1795_v59  ;;  %v1790_v62 = vadd.f32 %v1782_v50, %v3077_v33  ;;  %v1791_v61 = vadd.f32 %v1783_v23, %v3077_v33 }
 0xde9   :  { %v1812_v54 = vmax.f32 %v1804_v30, 0.0  ;;  %v1813_v47 = vmax.f32 %v1805_v10, 0.0  ;;  %v1015_v24 = vadd.f32 %v1007_v25, %v987_v11  ;;  %v1016_v21 = vadd.f32 %v1007_v25, %v988_v44 }
 0xdea   :  { %v1810_v52 = vmax.f32 %v1802_v55, 0.0  ;;  %v1811_v2 = vmax.f32 %v1803_v6, 0.0  ;;  %v1798_v3 = vmax.f32 %v1790_v62, 0.0  ;;  %v1799_v16 = vmax.f32 %v1791_v61, 0.0 }
 0xdeb   :  { %1821 = vst [vmem:[#allocation5 + $0x50] sm:$0xff] %v1812_v54  ;;  %1822 = vst [vmem:[#allocation5 + $0x58] sm:$0xff] %v1813_v47  ;;  %v1023_v14 = vmax.f32 %v1015_v24, 0.0  ;;  %v1024_v17 = vmax.f32 %v1016_v21, 0.0  ;;  %v1792_v8 = vadd.f32 %v1784_v41, %v1007_v25  ;;  %v1793_v12 = vadd.f32 %v1785_v35, %v1007_v25 }
 0xdec   :  { %1819 = vst [vmem:[#allocation5 + $0x40] sm:$0xff] %v1810_v52  ;;  %1820 = vst [vmem:[#allocation5 + $0x48] sm:$0xff] %v1811_v2  ;;  %v1806_v46 = vadd.f32 %v2157_v49, %v1798_v3  ;;  %v1807_v33 = vadd.f32 %v2158_v4, %v1799_v16 }
 0xded   :  { %v1031_v48 = vadd.f32 %v2159_v27, %v1023_v14  ;;  %v1032_v7 = vadd.f32 %v2160_v19, %v1024_v17  ;;  %v1800_v22 = vmax.f32 %v1792_v8, 0.0  ;;  %v1801_v38 = vmax.f32 %v1793_v12, 0.0 }
 0xdee   :  { %v1814_v5 = vmax.f32 %v1806_v46, 0.0  ;;  %v1815_v39 = vmax.f32 %v1807_v33, 0.0 }
 0xdef   :  { %v1039_v57 = vmax.f32 %v1031_v48, 0.0  ;;  %v1040_v40 = vmax.f32 %v1032_v7, 0.0  ;;  %v1808_v29 = vadd.f32 %v2161_v28, %v1800_v22  ;;  %v1809_v36 = vadd.f32 %v2162_v53, %v1801_v38 }
 0xdf0   :  { %1823 = vst [vmem:[#allocation5 + $0x60] sm:$0xff] %v1814_v5  ;;  %1824 = vst [vmem:[#allocation5 + $0x68] sm:$0xff] %v1815_v39 }
 0xdf1   :  { %1047 = vst [vmem:[#allocation5 + $0x30] sm:$0xff] %v1039_v57  ;;  %1048 = vst [vmem:[#allocation5 + $0x38] sm:$0xff] %v1040_v40  ;;  %v1816_v15 = vmax.f32 %v1808_v29, 0.0  ;;  %v1817_v13 = vmax.f32 %v1809_v36, 0.0 }
 0xdf3   :  { %1825 = vst [vmem:[#allocation5 + $0x70] sm:$0xff] %v1816_v15  ;;  %1826 = vst [vmem:[#allocation5 + $0x78] sm:$0xff] %v1817_v13 }
 0xdf4   :  { %2196 = shalt.err (!%p2193_p12)
}
 0xdf5   :  { %s2197_s25 = scalar_lea.hbm %s3141_s16, 2048 }
 0xdf6   :  { %p2198_p13 = scmp.ne.s32.totalorder %s3141_s16, %s2197_s25  ;;  %p2201_p0 = scmp.lt.u32.totalorder %s2197_s25, %s3141_s16 }
 0xdf8   :  { %p2203_p1 = pnand %p2201_p0, %p2198_p13 }
 0xdfa   :  { %2206 = shalt.err (!%p2203_p1)
}
 0xdfb   :  { %1838 = dma.vmem_to_hbm [thread:$0]  %s1833_s19, 2048, %s3141_s16, [#allocation4], %s2212_s17, %s2212_s17, %s2213_s18  }
 0xdfc   :  { %2209 = dma.done.wait [#allocation4], 2048  }
 0xdfd   :  { %2210 = vsyncadd [#allocation4], 4294965248 }
 0xdfe   :  { %1842 = vsyncpa [#allocation3], 1 }
 0xdff   :  { %1843 = vsyncpa [#allocation4], 1 }

</bundles_post_ra>
